<compile_context>
chip_gen: v5e
topology: v5e:2x2
jax: 0.10.0
libtpu: 0.0.40
codegen_flags: <defaults>
</compile_context>

<pallas_src>
import functools
import math

import jax
import jax.numpy as jnp
from jax.experimental import pallas as pl
from jax.experimental.pallas import tpu as pltpu


# ----------------------------- fused kernel ---------------------------------
def _decoder_kernel(Bb, T, S, nhead, compute_dtype,
                    tgt_ref, src_ref,
                    wq1_ref, wk1_ref, wv1_ref, bq1_ref, bk1_ref, bv1_ref,
                    wo1_ref, bo1_ref,
                    wq2_ref, wk2_ref, wv2_ref, bq2_ref, bk2_ref, bv2_ref,
                    wo2_ref, bo2_ref,
                    ln_ref, wff1_ref, bff1_ref, wff2_ref, bff2_ref,
                    out_ref, x_scr):
    layer = pl.program_id(1)                 # inner ("arbitrary") grid axis
    D = tgt_ref.shape[-1]
    hd = D // nhead
    scale = 1.0 / math.sqrt(hd)
    cdt = compute_dtype

    # Layer 0 of every batch block: load the resident activation from tgt.
    @pl.when(layer == 0)
    def _init():
        x_scr[...] = tgt_ref[...].astype(jnp.float32)

    x = x_scr[...]                           # (Bb*T, D) f32, resident in VMEM
    mem = src_ref[...].astype(jnp.float32)   # (Bb*S, D)

    def matmul(a, w_ref, b_ref):
        # lane-dense (rows, D/F) matmul, MXU operands in compute dtype,
        # f32 accumulation, bias added in f32.
        return (jnp.dot(a.astype(cdt), w_ref[0].astype(cdt),
                        preferred_element_type=jnp.float32)
                + b_ref[0].astype(jnp.float32))

    def mha(q_in, kv_in, Tq, Skv, wq_ref, wk_ref, wv_ref,
            bq_ref, bk_ref, bv_ref, wo_ref, bo_ref):
        q = matmul(q_in, wq_ref, bq_ref)                 # (Bb*Tq, D)
        k = matmul(kv_in, wk_ref, bk_ref)                # (Bb*Skv, D)
        v = matmul(kv_in, wv_ref, bv_ref)                # (Bb*Skv, D)
        q3 = (q * scale).reshape(Bb, Tq, D)
        k3 = k.reshape(Bb, Skv, D)
        v3 = v.reshape(Bb, Skv, D)
        heads = []
        for h in range(nhead):                           # static unroll
            lo = h * hd
            qh = q3[:, :, lo:lo + hd].astype(cdt)
            kh = k3[:, :, lo:lo + hd].astype(cdt)
            vh = v3[:, :, lo:lo + hd].astype(cdt)
            s = jnp.einsum('btd,bsd->bts', qh, kh,
                           preferred_element_type=jnp.float32)   # (Bb,Tq,Skv)
            s = s - jnp.max(s, axis=-1, keepdims=True)
            p = jnp.exp(s)
            p = p * pl.reciprocal(jnp.sum(p, axis=-1, keepdims=True),
                                  approx=True)
            heads.append(jnp.einsum('bts,bsd->btd', p.astype(cdt), vh,
                                    preferred_element_type=jnp.float32))
        # concat-heads + single (Bb*Tq, D) @ (D, D) output projection
        o = jnp.concatenate(heads, axis=-1).reshape(Bb * Tq, D)
        return matmul(o, wo_ref, bo_ref)

    def layernorm(y, g, b, eps=1e-5):
        mu = jnp.mean(y, axis=-1, keepdims=True)
        d = y - mu
        var = jnp.mean(d * d, axis=-1, keepdims=True)
        return d * jax.lax.rsqrt(var + eps) * g + b

    ln = ln_ref[0].astype(jnp.float32)       # (6, D): [g1,b1,g2,b2,g3,b3]

    # self-attention + add & norm1
    sa = mha(x, x, T, T, wq1_ref, wk1_ref, wv1_ref,
             bq1_ref, bk1_ref, bv1_ref, wo1_ref, bo1_ref)
    x = layernorm(x + sa, ln[0:1, :], ln[1:2, :])

    # cross-attention (queries from tgt, keys/values from src) + add & norm2
    ca = mha(x, mem, T, S, wq2_ref, wk2_ref, wv2_ref,
             bq2_ref, bk2_ref, bv2_ref, wo2_ref, bo2_ref)
    x = layernorm(x + ca, ln[2:3, :], ln[3:4, :])

    # feed-forward (ReLU) + add & norm3
    h1 = jnp.maximum(matmul(x, wff1_ref, bff1_ref), 0.0)
    ff = matmul(h1, wff2_ref, bff2_ref)
    x = layernorm(x + ff, ln[4:5, :], ln[5:6, :])

    x_scr[...] = x                           # stays resident for next layer
    out_ref[...] = x.astype(out_ref.dtype)


# ------------------------------- wrapper -------------------------------------
def transformer_decoder_pallas(tgt, src, params, nhead,
                               compute_dtype=jnp.bfloat16, batch_block=None):
    B, T, D = tgt.shape
    _, S, _ = src.shape
    L = len(params)
    F = params[0]['w_ff1'].shape[-1]
    f32 = jnp.float32
    wdt = compute_dtype

    # Pick the largest divisor of B so that Bb*T rows keep the MXU M-dim busy
    # (target ~128 rows per step) while still leaving batch blocks to shard.
    if batch_block is None:
        want = max(1, 128 // max(T, 1))
        batch_block = 1
        for c in range(1, B + 1):
            if B % c == 0 and c <= want:
                batch_block = c
    Bb = batch_block
    assert B % Bb == 0
    nb = B // Bb
    # NOTE: Bb*T must be a multiple of 8 (sublane) or equal to B*T.
    assert (Bb * T) % 8 == 0 or Bb == B

    # ---- stack per-layer weights on a leading "layer" axis, pre-split QKV ----
    def stack(name, dt):
        return jnp.stack([p[name] for p in params], axis=0).astype(dt)

    def split3(wname, bname):
        w = stack(wname, wdt)            # (L, D, 3D)
        b = stack(bname, f32)            # (L, 1, 3D)
        return (w[:, :, 0:D], w[:, :, D:2 * D], w[:, :, 2 * D:3 * D],
                b[:, :, 0:D], b[:, :, D:2 * D], b[:, :, 2 * D:3 * D])

    wq1, wk1, wv1, bq1, bk1, bv1 = split3('w_in1', 'b_in1')
    wq2, wk2, wv2, bq2, bk2, bv2 = split3('w_in2', 'b_in2')
    wo1, bo1 = stack('wo1', wdt), stack('bo1', f32)
    wo2, bo2 = stack('wo2', wdt), stack('bo2', f32)
    ln = stack('ln', f32)                # (L, 6, D)
    wff1, bff1 = stack('w_ff1', wdt), stack('b_ff1', f32)
    wff2, bff2 = stack('w_ff2', wdt), stack('b_ff2', f32)

    weights = [wq1, wk1, wv1, bq1, bk1, bv1, wo1, bo1,
               wq2, wk2, wv2, bq2, bk2, bv2, wo2, bo2,
               ln, wff1, bff1, wff2, bff2]

    tgt2d = tgt.reshape(B * T, D).astype(f32)
    src2d = src.reshape(B * S, D).astype(f32)

    def wspec(arr):
        blk = (1,) + tuple(arr.shape[1:])
        return pl.BlockSpec(blk, lambda b, l: (l, 0, 0))

    in_specs = ([pl.BlockSpec((Bb * T, D), lambda b, l: (b, 0)),     # tgt rows
                 pl.BlockSpec((Bb * S, D), lambda b, l: (b, 0))]     # src rows
                + [wspec(w) for w in weights])
    out_spec = pl.BlockSpec((Bb * T, D), lambda b, l: (b, 0))

    # ---- explicit VMEM budget with headroom (v7x has only 64 MiB / TC) ----
    blk_bytes = (3 * Bb * T * D * 4 + Bb * S * D * 4      # tgt/out/scratch + src
                 + sum(math.prod(w.shape[1:]) * w.dtype.itemsize for w in weights))
    vmem_limit = int(min(max(3 * blk_bytes, 16 * 2 ** 20), 48 * 2 ** 20))

    # ---- advisory cost estimate for the XLA scheduler ----
    flops_layer = (12 * B * T * D * D + 4 * B * T * T * D
                   + 4 * B * S * D * D + 4 * B * T * S * D
                   + 4 * B * T * D * F)
    trans_layer = B * nhead * (T * T + T * S) + 6 * B * T
    bytes_acc = (sum(w.size * w.dtype.itemsize for w in weights)
                 + (2 * B * T * D + B * S * D) * 4)
    cost = pl.CostEstimate(flops=int(L * flops_layer),
                           transcendentals=int(L * trans_layer),
                           bytes_accessed=int(bytes_acc))

    kernel = functools.partial(_decoder_kernel, Bb, T, S, nhead, compute_dtype)
    out2d = pl.pallas_call(
        kernel,
        out_shape=jax.ShapeDtypeStruct((B * T, D), tgt.dtype),
        grid_spec=pltpu.PrefetchScalarGridSpec(
            num_scalar_prefetch=0,
            grid=(nb, L),
            in_specs=in_specs,
            out_specs=out_spec,
            scratch_shapes=[pltpu.VMEM((Bb * T, D), jnp.float32)]),
        compiler_params=pltpu.CompilerParams(
            dimension_semantics=("parallel", "arbitrary"),
            vmem_limit_bytes=vmem_limit),
        cost_estimate=cost,
    )(tgt2d, src2d, *weights)
    return out2d.reshape(B, T, D)


# ---------------- pure-JAX reference (for correctness check) ----------------
def _layer_ref(x, mem, p, nhead):
    D = x.shape[-1]
    hd = D // nhead
    scale = 1.0 / math.sqrt(hd)

    def mha(q_in, kv_in, w_in, b_in, wo, bo):
        q = q_in @ w_in[:, :D] + b_in[:, :D]
        k = kv_in @ w_in[:, D:2 * D] + b_in[:, D:2 * D]
        v = kv_in @ w_in[:, 2 * D:] + b_in[:, 2 * D:]
        outs = []
        for h in range(nhead):
            lo, hi = h * hd, (h + 1) * hd
            s = (q[:, :, lo:hi] * scale) @ jnp.swapaxes(k[:, :, lo:hi], -1, -2)
            p_ = jax.nn.softmax(s, axis=-1)
            outs.append(p_ @ v[:, :, lo:hi])
        return jnp.concatenate(outs, axis=-1) @ wo + bo

    def ln(y, g, b, eps=1e-5):
        mu = jnp.mean(y, -1, keepdims=True)
        var = jnp.mean((y - mu) ** 2, -1, keepdims=True)
        return (y - mu) * jax.lax.rsqrt(var + eps) * g + b

    L = p['ln']
    x = ln(x + mha(x, x, p['w_in1'], p['b_in1'], p['wo1'], p['bo1']), L[0:1], L[1:2])
    x = ln(x + mha(x, mem, p['w_in2'], p['b_in2'], p['wo2'], p['bo2']), L[2:3], L[3:4])
    ff = jnp.maximum(x @ p['w_ff1'] + p['b_ff1'], 0.0) @ p['w_ff2'] + p['b_ff2']
    x = ln(x + ff, L[4:5], L[5:6])
    return x


def transformer_decoder_ref(tgt, src, params, nhead):
    out = tgt
    for p in params:
        out = _layer_ref(out, src, p, nhead)
    return out


# ---------------- deterministic parameter init ----------------
def init_params(key, num_layers, D, F):
    params = []
    for _ in range(num_layers):
        key, k0, k1, k2, k3, k4, k5 = jax.random.split(key, 7)
        std = 0.05
        params.append(dict(
            w_in1=jax.random.normal(k0, (D, 3 * D), jnp.float32) * std,
            b_in1=jnp.zeros((1, 3 * D), jnp.float32),
            wo1=jax.random.normal(k1, (D, D), jnp.float32) * std,
            bo1=jnp.zeros((1, D), jnp.float32),
            w_in2=jax.random.normal(k2, (D, 3 * D), jnp.float32) * std,
            b_in2=jnp.zeros((1, 3 * D), jnp.float32),
            wo2=jax.random.normal(k3, (D, D), jnp.float32) * std,
            bo2=jnp.zeros((1, D), jnp.float32),
            ln=jnp.concatenate(
                [jnp.ones((1, D)), jnp.zeros((1, D))] * 3, axis=0
            ).astype(jnp.float32),
            w_ff1=jax.random.normal(k4, (D, F), jnp.float32) * std,
            b_ff1=jnp.zeros((1, F), jnp.float32),
            w_ff2=jax.random.normal(k5, (F, D), jnp.float32) * std,
            b_ff2=jnp.zeros((1, D), jnp.float32),
        ))
    return params


if __name__ == "__main__":
    B, T, S, D, F_FF = 2, 8, 16, 32, 64
    NHEAD, NUM_LAYERS = 4, 2

    key = jax.random.PRNGKey(0)
    k_tgt, k_src, k_par = jax.random.split(key, 3)
    tgt = jax.random.normal(k_tgt, (B, T, D), jnp.float32)   # decoder queries
    src = jax.random.normal(k_src, (B, S, D), jnp.float32)   # encoder memory
    params = init_params(k_par, NUM_LAYERS, D, F_FF)

    ref = jax.block_until_ready(transformer_decoder_ref(tgt, src, params, NHEAD))

    # f32 compute path: tight tolerance vs. the pure-JAX reference.
    out_f32 = jax.block_until_ready(
        transformer_decoder_pallas(tgt, src, params, NHEAD,
                                   compute_dtype=jnp.float32))
    assert out_f32.shape == (B, T, D)
    assert jnp.allclose(out_f32, ref, atol=1e-2, rtol=1e-2), \
        f"f32 max abs err {jnp.max(jnp.abs(out_f32 - ref))}"

    # bf16 MXU-operand path (f32 accumulation): looser tolerance.
    out_bf16 = jax.block_until_ready(
        transformer_decoder_pallas(tgt, src, params, NHEAD,
                                   compute_dtype=jnp.bfloat16))
    assert out_bf16.shape == (B, T, D)
    assert jnp.allclose(out_bf16, ref, atol=5e-2, rtol=5e-2), \
        f"bf16 max abs err {jnp.max(jnp.abs(out_bf16 - ref))}"

    print("KERNEL_OK")
</pallas_src>

<mosaic_0001>
module attributes {stable_mosaic.version = 11 : i64} {
  func.func @_decoder_kernel(%arg0: i32, %arg1: i32, %arg2: memref<16x32xf32, #tpu.memory_space<vmem>>, %arg3: memref<32x32xf32, #tpu.memory_space<vmem>>, %arg4: memref<1x32x32xf32, #tpu.memory_space<vmem>>, %arg5: memref<1x32x32xf32, #tpu.memory_space<vmem>>, %arg6: memref<1x32x32xf32, #tpu.memory_space<vmem>>, %arg7: memref<1x1x32xf32, #tpu.memory_space<vmem>>, %arg8: memref<1x1x32xf32, #tpu.memory_space<vmem>>, %arg9: memref<1x1x32xf32, #tpu.memory_space<vmem>>, %arg10: memref<1x32x32xf32, #tpu.memory_space<vmem>>, %arg11: memref<1x1x32xf32, #tpu.memory_space<vmem>>, %arg12: memref<1x32x32xf32, #tpu.memory_space<vmem>>, %arg13: memref<1x32x32xf32, #tpu.memory_space<vmem>>, %arg14: memref<1x32x32xf32, #tpu.memory_space<vmem>>, %arg15: memref<1x1x32xf32, #tpu.memory_space<vmem>>, %arg16: memref<1x1x32xf32, #tpu.memory_space<vmem>>, %arg17: memref<1x1x32xf32, #tpu.memory_space<vmem>>, %arg18: memref<1x32x32xf32, #tpu.memory_space<vmem>>, %arg19: memref<1x1x32xf32, #tpu.memory_space<vmem>>, %arg20: memref<1x6x32xf32, #tpu.memory_space<vmem>>, %arg21: memref<1x32x64xf32, #tpu.memory_space<vmem>>, %arg22: memref<1x1x64xf32, #tpu.memory_space<vmem>>, %arg23: memref<1x64x32xf32, #tpu.memory_space<vmem>>, %arg24: memref<1x1x32xf32, #tpu.memory_space<vmem>>, %arg25: memref<16x32xf32, #tpu.memory_space<vmem>>, %arg26: memref<16x32xf32, #tpu.memory_space<vmem>>) attributes {dimension_semantics = [#tpu.dimension_semantics<parallel>, #tpu.dimension_semantics<arbitrary>], iteration_bounds = array<i64: 1, 2>, scalar_prefetch = 0 : i64, scratch_operands = 1 : i64, tpu.core_type = #tpu.core_type<tc>, window_params = [{transform_indices = @transform_0, window_bounds = array<i64: 16, 32>}, {transform_indices = @transform_1, window_bounds = array<i64: 32, 32>}, {transform_indices = @transform_2, window_bounds = array<i64: 1, 32, 32>}, {transform_indices = @transform_3, window_bounds = array<i64: 1, 32, 32>}, {transform_indices = @transform_4, window_bounds = array<i64: 1, 32, 32>}, {transform_indices = @transform_5, window_bounds = array<i64: 1, 1, 32>}, {transform_indices = @transform_6, window_bounds = array<i64: 1, 1, 32>}, {transform_indices = @transform_7, window_bounds = array<i64: 1, 1, 32>}, {transform_indices = @transform_8, window_bounds = array<i64: 1, 32, 32>}, {transform_indices = @transform_9, window_bounds = array<i64: 1, 1, 32>}, {transform_indices = @transform_10, window_bounds = array<i64: 1, 32, 32>}, {transform_indices = @transform_11, window_bounds = array<i64: 1, 32, 32>}, {transform_indices = @transform_12, window_bounds = array<i64: 1, 32, 32>}, {transform_indices = @transform_13, window_bounds = array<i64: 1, 1, 32>}, {transform_indices = @transform_14, window_bounds = array<i64: 1, 1, 32>}, {transform_indices = @transform_15, window_bounds = array<i64: 1, 1, 32>}, {transform_indices = @transform_16, window_bounds = array<i64: 1, 32, 32>}, {transform_indices = @transform_17, window_bounds = array<i64: 1, 1, 32>}, {transform_indices = @transform_18, window_bounds = array<i64: 1, 6, 32>}, {transform_indices = @transform_19, window_bounds = array<i64: 1, 32, 64>}, {transform_indices = @transform_20, window_bounds = array<i64: 1, 1, 64>}, {transform_indices = @transform_21, window_bounds = array<i64: 1, 64, 32>}, {transform_indices = @transform_22, window_bounds = array<i64: 1, 1, 32>}, {transform_indices = @transform_23, window_bounds = array<i64: 16, 32>}]} {
    %c0_i32 = arith.constant 0 : i32
    %0 = arith.cmpi eq, %arg1, %c0_i32 : i32
    %1 = arith.extui %0 : i1 to i32
    %c0_i32_0 = arith.constant 0 : i32
    %2 = arith.cmpi ne, %1, %c0_i32_0 : i32
    scf.if %2 {
      %c0_130 = arith.constant 0 : index
      %c0_131 = arith.constant 0 : index
      %284 = vector.load %arg2[%c0_130, %c0_131] : memref<16x32xf32, #tpu.memory_space<vmem>>, vector<16x32xf32>
      %c0_132 = arith.constant 0 : index
      %c0_133 = arith.constant 0 : index
      %285 = vector.load %arg26[%c0_132, %c0_133] : memref<16x32xf32, #tpu.memory_space<vmem>>, vector<16x32xf32>
      tpu.vector_store %arg26[%c0_132, %c0_133], %284 {strides = array<i32>} : memref<16x32xf32, #tpu.memory_space<vmem>>, vector<16x32xf32>,
    } else {
    }
    %c0 = arith.constant 0 : index
    %c0_1 = arith.constant 0 : index
    %3 = vector.load %arg26[%c0, %c0_1] : memref<16x32xf32, #tpu.memory_space<vmem>>, vector<16x32xf32>
    %c0_2 = arith.constant 0 : index
    %c0_3 = arith.constant 0 : index
    %4 = vector.load %arg3[%c0_2, %c0_3] : memref<32x32xf32, #tpu.memory_space<vmem>>, vector<32x32xf32>
    %c0_4 = arith.constant 0 : index
    %c0_5 = arith.constant 0 : index
    %c0_6 = arith.constant 0 : index
    %5 = vector.load %arg20[%c0_4, %c0_5, %c0_6] : memref<1x6x32xf32, #tpu.memory_space<vmem>>, vector<1x6x32xf32>
    %6 = vector.shape_cast %5 : vector<1x6x32xf32> to vector<6x32xf32>
    %c0_7 = arith.constant 0 : index
    %c0_8 = arith.constant 0 : index
    %c0_9 = arith.constant 0 : index
    %7 = vector.load %arg4[%c0_7, %c0_8, %c0_9] : memref<1x32x32xf32, #tpu.memory_space<vmem>>, vector<1x32x32xf32>
    %8 = vector.shape_cast %7 : vector<1x32x32xf32> to vector<32x32xf32>
    %cst = arith.constant dense<0.000000e+00> : vector<16x32xf32>
    %9 = tpu.matmul %3, %8, %cst {dimension_numbers = #tpu.dot_dimension_numbers<[1], [0], [0], [1], [0, 0, 1, 1], [], []>} : vector<16x32xf32>, vector<32x32xf32>, vector<16x32xf32> -> vector<16x32xf32>
    %c0_10 = arith.constant 0 : index
    %c0_11 = arith.constant 0 : index
    %c0_12 = arith.constant 0 : index
    %10 = vector.load %arg7[%c0_10, %c0_11, %c0_12] : memref<1x1x32xf32, #tpu.memory_space<vmem>>, vector<1x1x32xf32>
    %11 = vector.shape_cast %10 : vector<1x1x32xf32> to vector<1x32xf32>
    %12 = vector.broadcast %11 : vector<1x32xf32> to vector<16x32xf32>
    %13 = arith.addf %9, %12 : vector<16x32xf32>
    %c0_13 = arith.constant 0 : index
    %c0_14 = arith.constant 0 : index
    %c0_15 = arith.constant 0 : index
    %14 = vector.load %arg5[%c0_13, %c0_14, %c0_15] : memref<1x32x32xf32, #tpu.memory_space<vmem>>, vector<1x32x32xf32>
    %15 = vector.shape_cast %14 : vector<1x32x32xf32> to vector<32x32xf32>
    %cst_16 = arith.constant dense<0.000000e+00> : vector<16x32xf32>
    %16 = tpu.matmul %3, %15, %cst_16 {dimension_numbers = #tpu.dot_dimension_numbers<[1], [0], [0], [1], [0, 0, 1, 1], [], []>} : vector<16x32xf32>, vector<32x32xf32>, vector<16x32xf32> -> vector<16x32xf32>
    %c0_17 = arith.constant 0 : index
    %c0_18 = arith.constant 0 : index
    %c0_19 = arith.constant 0 : index
    %17 = vector.load %arg8[%c0_17, %c0_18, %c0_19] : memref<1x1x32xf32, #tpu.memory_space<vmem>>, vector<1x1x32xf32>
    %18 = vector.shape_cast %17 : vector<1x1x32xf32> to vector<1x32xf32>
    %19 = vector.broadcast %18 : vector<1x32xf32> to vector<16x32xf32>
    %20 = arith.addf %16, %19 : vector<16x32xf32>
    %c0_20 = arith.constant 0 : index
    %c0_21 = arith.constant 0 : index
    %c0_22 = arith.constant 0 : index
    %21 = vector.load %arg6[%c0_20, %c0_21, %c0_22] : memref<1x32x32xf32, #tpu.memory_space<vmem>>, vector<1x32x32xf32>
    %22 = vector.shape_cast %21 : vector<1x32x32xf32> to vector<32x32xf32>
    %cst_23 = arith.constant dense<0.000000e+00> : vector<16x32xf32>
    %23 = tpu.matmul %3, %22, %cst_23 {dimension_numbers = #tpu.dot_dimension_numbers<[1], [0], [0], [1], [0, 0, 1, 1], [], []>} : vector<16x32xf32>, vector<32x32xf32>, vector<16x32xf32> -> vector<16x32xf32>
    %c0_24 = arith.constant 0 : index
    %c0_25 = arith.constant 0 : index
    %c0_26 = arith.constant 0 : index
    %24 = vector.load %arg9[%c0_24, %c0_25, %c0_26] : memref<1x1x32xf32, #tpu.memory_space<vmem>>, vector<1x1x32xf32>
    %25 = vector.shape_cast %24 : vector<1x1x32xf32> to vector<1x32xf32>
    %26 = vector.broadcast %25 : vector<1x32xf32> to vector<16x32xf32>
    %27 = arith.addf %23, %26 : vector<16x32xf32>
    %cst_27 = arith.constant 0.353553385 : f32
    %28 = vector.broadcast %cst_27 : f32 to vector<16x32xf32>
    %29 = arith.mulf %13, %28 : vector<16x32xf32>
    %30 = vector.shape_cast %29 : vector<16x32xf32> to vector<2x8x32xf32>
    %31 = vector.shape_cast %20 : vector<16x32xf32> to vector<2x8x32xf32>
    %32 = vector.shape_cast %27 : vector<16x32xf32> to vector<2x8x32xf32>
    %33 = vector.extract_strided_slice %30 {offsets = [0, 0, 0], sizes = [2, 8, 8], strides = [1, 1, 1]} : vector<2x8x32xf32> to vector<2x8x8xf32>
    %34 = vector.extract_strided_slice %31 {offsets = [0, 0, 0], sizes = [2, 8, 8], strides = [1, 1, 1]} : vector<2x8x32xf32> to vector<2x8x8xf32>
    %35 = vector.extract_strided_slice %32 {offsets = [0, 0, 0], sizes = [2, 8, 8], strides = [1, 1, 1]} : vector<2x8x32xf32> to vector<2x8x8xf32>
    "tpu.trace_start"() <{level = 10 : i32, message = "btd,bsd->bts"}> : () -> ()
    %cst_28 = arith.constant dense<0.000000e+00> : vector<2x8x8xf32>
    %36 = tpu.matmul %33, %34, %cst_28 {dimension_numbers = #tpu.dot_dimension_numbers<[2], [2], [1], [1], [0, 0, 0, 1, 1, 1], [0], [0]>} : vector<2x8x8xf32>, vector<2x8x8xf32>, vector<2x8x8xf32> -> vector<2x8x8xf32>
    "tpu.trace_stop"() : () -> ()
    %cst_29 = arith.constant dense<0xFF800000> : vector<2x8xf32>
    %37 = vector.multi_reduction <maximumf>, %36, %cst_29 [2] : vector<2x8x8xf32> to vector<2x8xf32>
    %38 = vector.shape_cast %37 : vector<2x8xf32> to vector<2x8x1xf32>
    %39 = vector.broadcast %38 : vector<2x8x1xf32> to vector<2x8x8xf32>
    %40 = arith.subf %36, %39 : vector<2x8x8xf32>
    %41 = math.exp %40 : vector<2x8x8xf32>
    %cst_30 = arith.constant dense<0.000000e+00> : vector<2x8xf32>
    %42 = vector.multi_reduction <add>, %41, %cst_30 [2] : vector<2x8x8xf32> to vector<2x8xf32>
    %43 = vector.shape_cast %42 : vector<2x8xf32> to vector<2x8x1xf32>
    %44 = tpu.reciprocal %43 {approx = true} : vector<2x8x1xf32> -> vector<2x8x1xf32>
    %45 = vector.broadcast %44 : vector<2x8x1xf32> to vector<2x8x8xf32>
    %46 = arith.mulf %41, %45 : vector<2x8x8xf32>
    "tpu.trace_start"() <{level = 10 : i32, message = "bts,bsd->btd"}> : () -> ()
    %cst_31 = arith.constant dense<0.000000e+00> : vector<2x8x8xf32>
    %47 = tpu.matmul %46, %35, %cst_31 {dimension_numbers = #tpu.dot_dimension_numbers<[2], [1], [1], [2], [0, 0, 0, 1, 1, 2], [0], [0]>} : vector<2x8x8xf32>, vector<2x8x8xf32>, vector<2x8x8xf32> -> vector<2x8x8xf32>
    "tpu.trace_stop"() : () -> ()
    %48 = vector.extract_strided_slice %30 {offsets = [0, 0, 8], sizes = [2, 8, 8], strides = [1, 1, 1]} : vector<2x8x32xf32> to vector<2x8x8xf32>
    %49 = vector.extract_strided_slice %31 {offsets = [0, 0, 8], sizes = [2, 8, 8], strides = [1, 1, 1]} : vector<2x8x32xf32> to vector<2x8x8xf32>
    %50 = vector.extract_strided_slice %32 {offsets = [0, 0, 8], sizes = [2, 8, 8], strides = [1, 1, 1]} : vector<2x8x32xf32> to vector<2x8x8xf32>
    "tpu.trace_start"() <{level = 10 : i32, message = "btd,bsd->bts"}> : () -> ()
    %cst_32 = arith.constant dense<0.000000e+00> : vector<2x8x8xf32>
    %51 = tpu.matmul %48, %49, %cst_32 {dimension_numbers = #tpu.dot_dimension_numbers<[2], [2], [1], [1], [0, 0, 0, 1, 1, 1], [0], [0]>} : vector<2x8x8xf32>, vector<2x8x8xf32>, vector<2x8x8xf32> -> vector<2x8x8xf32>
    "tpu.trace_stop"() : () -> ()
    %cst_33 = arith.constant dense<0xFF800000> : vector<2x8xf32>
    %52 = vector.multi_reduction <maximumf>, %51, %cst_33 [2] : vector<2x8x8xf32> to vector<2x8xf32>
    %53 = vector.shape_cast %52 : vector<2x8xf32> to vector<2x8x1xf32>
    %54 = vector.broadcast %53 : vector<2x8x1xf32> to vector<2x8x8xf32>
    %55 = arith.subf %51, %54 : vector<2x8x8xf32>
    %56 = math.exp %55 : vector<2x8x8xf32>
    %cst_34 = arith.constant dense<0.000000e+00> : vector<2x8xf32>
    %57 = vector.multi_reduction <add>, %56, %cst_34 [2] : vector<2x8x8xf32> to vector<2x8xf32>
    %58 = vector.shape_cast %57 : vector<2x8xf32> to vector<2x8x1xf32>
    %59 = tpu.reciprocal %58 {approx = true} : vector<2x8x1xf32> -> vector<2x8x1xf32>
    %60 = vector.broadcast %59 : vector<2x8x1xf32> to vector<2x8x8xf32>
    %61 = arith.mulf %56, %60 : vector<2x8x8xf32>
    "tpu.trace_start"() <{level = 10 : i32, message = "bts,bsd->btd"}> : () -> ()
    %cst_35 = arith.constant dense<0.000000e+00> : vector<2x8x8xf32>
    %62 = tpu.matmul %61, %50, %cst_35 {dimension_numbers = #tpu.dot_dimension_numbers<[2], [1], [1], [2], [0, 0, 0, 1, 1, 2], [0], [0]>} : vector<2x8x8xf32>, vector<2x8x8xf32>, vector<2x8x8xf32> -> vector<2x8x8xf32>
    "tpu.trace_stop"() : () -> ()
    %63 = vector.extract_strided_slice %30 {offsets = [0, 0, 16], sizes = [2, 8, 8], strides = [1, 1, 1]} : vector<2x8x32xf32> to vector<2x8x8xf32>
    %64 = vector.extract_strided_slice %31 {offsets = [0, 0, 16], sizes = [2, 8, 8], strides = [1, 1, 1]} : vector<2x8x32xf32> to vector<2x8x8xf32>
    %65 = vector.extract_strided_slice %32 {offsets = [0, 0, 16], sizes = [2, 8, 8], strides = [1, 1, 1]} : vector<2x8x32xf32> to vector<2x8x8xf32>
    "tpu.trace_start"() <{level = 10 : i32, message = "btd,bsd->bts"}> : () -> ()
    %cst_36 = arith.constant dense<0.000000e+00> : vector<2x8x8xf32>
    %66 = tpu.matmul %63, %64, %cst_36 {dimension_numbers = #tpu.dot_dimension_numbers<[2], [2], [1], [1], [0, 0, 0, 1, 1, 1], [0], [0]>} : vector<2x8x8xf32>, vector<2x8x8xf32>, vector<2x8x8xf32> -> vector<2x8x8xf32>
    "tpu.trace_stop"() : () -> ()
    %cst_37 = arith.constant dense<0xFF800000> : vector<2x8xf32>
    %67 = vector.multi_reduction <maximumf>, %66, %cst_37 [2] : vector<2x8x8xf32> to vector<2x8xf32>
    %68 = vector.shape_cast %67 : vector<2x8xf32> to vector<2x8x1xf32>
    %69 = vector.broadcast %68 : vector<2x8x1xf32> to vector<2x8x8xf32>
    %70 = arith.subf %66, %69 : vector<2x8x8xf32>
    %71 = math.exp %70 : vector<2x8x8xf32>
    %cst_38 = arith.constant dense<0.000000e+00> : vector<2x8xf32>
    %72 = vector.multi_reduction <add>, %71, %cst_38 [2] : vector<2x8x8xf32> to vector<2x8xf32>
    %73 = vector.shape_cast %72 : vector<2x8xf32> to vector<2x8x1xf32>
    %74 = tpu.reciprocal %73 {approx = true} : vector<2x8x1xf32> -> vector<2x8x1xf32>
    %75 = vector.broadcast %74 : vector<2x8x1xf32> to vector<2x8x8xf32>
    %76 = arith.mulf %71, %75 : vector<2x8x8xf32>
    "tpu.trace_start"() <{level = 10 : i32, message = "bts,bsd->btd"}> : () -> ()
    %cst_39 = arith.constant dense<0.000000e+00> : vector<2x8x8xf32>
    %77 = tpu.matmul %76, %65, %cst_39 {dimension_numbers = #tpu.dot_dimension_numbers<[2], [1], [1], [2], [0, 0, 0, 1, 1, 2], [0], [0]>} : vector<2x8x8xf32>, vector<2x8x8xf32>, vector<2x8x8xf32> -> vector<2x8x8xf32>
    "tpu.trace_stop"() : () -> ()
    %78 = vector.extract_strided_slice %30 {offsets = [0, 0, 24], sizes = [2, 8, 8], strides = [1, 1, 1]} : vector<2x8x32xf32> to vector<2x8x8xf32>
    %79 = vector.extract_strided_slice %31 {offsets = [0, 0, 24], sizes = [2, 8, 8], strides = [1, 1, 1]} : vector<2x8x32xf32> to vector<2x8x8xf32>
    %80 = vector.extract_strided_slice %32 {offsets = [0, 0, 24], sizes = [2, 8, 8], strides = [1, 1, 1]} : vector<2x8x32xf32> to vector<2x8x8xf32>
    "tpu.trace_start"() <{level = 10 : i32, message = "btd,bsd->bts"}> : () -> ()
    %cst_40 = arith.constant dense<0.000000e+00> : vector<2x8x8xf32>
    %81 = tpu.matmul %78, %79, %cst_40 {dimension_numbers = #tpu.dot_dimension_numbers<[2], [2], [1], [1], [0, 0, 0, 1, 1, 1], [0], [0]>} : vector<2x8x8xf32>, vector<2x8x8xf32>, vector<2x8x8xf32> -> vector<2x8x8xf32>
    "tpu.trace_stop"() : () -> ()
    %cst_41 = arith.constant dense<0xFF800000> : vector<2x8xf32>
    %82 = vector.multi_reduction <maximumf>, %81, %cst_41 [2] : vector<2x8x8xf32> to vector<2x8xf32>
    %83 = vector.shape_cast %82 : vector<2x8xf32> to vector<2x8x1xf32>
    %84 = vector.broadcast %83 : vector<2x8x1xf32> to vector<2x8x8xf32>
    %85 = arith.subf %81, %84 : vector<2x8x8xf32>
    %86 = math.exp %85 : vector<2x8x8xf32>
    %cst_42 = arith.constant dense<0.000000e+00> : vector<2x8xf32>
    %87 = vector.multi_reduction <add>, %86, %cst_42 [2] : vector<2x8x8xf32> to vector<2x8xf32>
    %88 = vector.shape_cast %87 : vector<2x8xf32> to vector<2x8x1xf32>
    %89 = tpu.reciprocal %88 {approx = true} : vector<2x8x1xf32> -> vector<2x8x1xf32>
    %90 = vector.broadcast %89 : vector<2x8x1xf32> to vector<2x8x8xf32>
    %91 = arith.mulf %86, %90 : vector<2x8x8xf32>
    "tpu.trace_start"() <{level = 10 : i32, message = "bts,bsd->btd"}> : () -> ()
    %cst_43 = arith.constant dense<0.000000e+00> : vector<2x8x8xf32>
    %92 = tpu.matmul %91, %80, %cst_43 {dimension_numbers = #tpu.dot_dimension_numbers<[2], [1], [1], [2], [0, 0, 0, 1, 1, 2], [0], [0]>} : vector<2x8x8xf32>, vector<2x8x8xf32>, vector<2x8x8xf32> -> vector<2x8x8xf32>
    "tpu.trace_stop"() : () -> ()
    %93 = tpu.concatenate %47, %62, %77, %92 in 2 : vector<2x8x8xf32>, vector<2x8x8xf32>, vector<2x8x8xf32>, vector<2x8x8xf32> -> vector<2x8x32xf32>
    %94 = vector.shape_cast %93 : vector<2x8x32xf32> to vector<16x32xf32>
    %c0_44 = arith.constant 0 : index
    %c0_45 = arith.constant 0 : index
    %c0_46 = arith.constant 0 : index
    %95 = vector.load %arg10[%c0_44, %c0_45, %c0_46] : memref<1x32x32xf32, #tpu.memory_space<vmem>>, vector<1x32x32xf32>
    %96 = vector.shape_cast %95 : vector<1x32x32xf32> to vector<32x32xf32>
    %cst_47 = arith.constant dense<0.000000e+00> : vector<16x32xf32>
    %97 = tpu.matmul %94, %96, %cst_47 {dimension_numbers = #tpu.dot_dimension_numbers<[1], [0], [0], [1], [0, 0, 1, 1], [], []>} : vector<16x32xf32>, vector<32x32xf32>, vector<16x32xf32> -> vector<16x32xf32>
    %c0_48 = arith.constant 0 : index
    %c0_49 = arith.constant 0 : index
    %c0_50 = arith.constant 0 : index
    %98 = vector.load %arg11[%c0_48, %c0_49, %c0_50] : memref<1x1x32xf32, #tpu.memory_space<vmem>>, vector<1x1x32xf32>
    %99 = vector.shape_cast %98 : vector<1x1x32xf32> to vector<1x32xf32>
    %100 = vector.broadcast %99 : vector<1x32xf32> to vector<16x32xf32>
    %101 = arith.addf %97, %100 : vector<16x32xf32>
    %102 = arith.addf %3, %101 : vector<16x32xf32>
    %103 = vector.extract_strided_slice %6 {offsets = [0, 0], sizes = [1, 32], strides = [1, 1]} : vector<6x32xf32> to vector<1x32xf32>
    %104 = vector.extract_strided_slice %6 {offsets = [1, 0], sizes = [1, 32], strides = [1, 1]} : vector<6x32xf32> to vector<1x32xf32>
    %cst_51 = arith.constant dense<0.000000e+00> : vector<16xf32>
    %105 = vector.multi_reduction <add>, %102, %cst_51 [1] : vector<16x32xf32> to vector<16xf32>
    %106 = vector.shape_cast %105 : vector<16xf32> to vector<16x1xf32>
    %cst_52 = arith.constant 3.200000e+01 : f32
    %107 = vector.broadcast %cst_52 : f32 to vector<16x1xf32>
    %108 = arith.divf %106, %107 : vector<16x1xf32>
    %109 = vector.broadcast %108 : vector<16x1xf32> to vector<16x32xf32>
    %110 = arith.subf %102, %109 : vector<16x32xf32>
    %111 = arith.mulf %110, %110 : vector<16x32xf32>
    %cst_53 = arith.constant dense<0.000000e+00> : vector<16xf32>
    %112 = vector.multi_reduction <add>, %111, %cst_53 [1] : vector<16x32xf32> to vector<16xf32>
    %113 = vector.shape_cast %112 : vector<16xf32> to vector<16x1xf32>
    %cst_54 = arith.constant 3.200000e+01 : f32
    %114 = vector.broadcast %cst_54 : f32 to vector<16x1xf32>
    %115 = arith.divf %113, %114 : vector<16x1xf32>
    %cst_55 = arith.constant 9.99999974E-6 : f32
    %116 = vector.broadcast %cst_55 : f32 to vector<16x1xf32>
    %117 = arith.addf %115, %116 : vector<16x1xf32>
    %118 = math.rsqrt %117 : vector<16x1xf32>
    %119 = vector.broadcast %118 : vector<16x1xf32> to vector<16x32xf32>
    %120 = arith.mulf %110, %119 : vector<16x32xf32>
    %121 = vector.broadcast %103 : vector<1x32xf32> to vector<16x32xf32>
    %122 = arith.mulf %120, %121 : vector<16x32xf32>
    %123 = vector.broadcast %104 : vector<1x32xf32> to vector<16x32xf32>
    %124 = arith.addf %122, %123 : vector<16x32xf32>
    %c0_56 = arith.constant 0 : index
    %c0_57 = arith.constant 0 : index
    %c0_58 = arith.constant 0 : index
    %125 = vector.load %arg12[%c0_56, %c0_57, %c0_58] : memref<1x32x32xf32, #tpu.memory_space<vmem>>, vector<1x32x32xf32>
    %126 = vector.shape_cast %125 : vector<1x32x32xf32> to vector<32x32xf32>
    %cst_59 = arith.constant dense<0.000000e+00> : vector<16x32xf32>
    %127 = tpu.matmul %124, %126, %cst_59 {dimension_numbers = #tpu.dot_dimension_numbers<[1], [0], [0], [1], [0, 0, 1, 1], [], []>} : vector<16x32xf32>, vector<32x32xf32>, vector<16x32xf32> -> vector<16x32xf32>
    %c0_60 = arith.constant 0 : index
    %c0_61 = arith.constant 0 : index
    %c0_62 = arith.constant 0 : index
    %128 = vector.load %arg15[%c0_60, %c0_61, %c0_62] : memref<1x1x32xf32, #tpu.memory_space<vmem>>, vector<1x1x32xf32>
    %129 = vector.shape_cast %128 : vector<1x1x32xf32> to vector<1x32xf32>
    %130 = vector.broadcast %129 : vector<1x32xf32> to vector<16x32xf32>
    %131 = arith.addf %127, %130 : vector<16x32xf32>
    %c0_63 = arith.constant 0 : index
    %c0_64 = arith.constant 0 : index
    %c0_65 = arith.constant 0 : index
    %132 = vector.load %arg13[%c0_63, %c0_64, %c0_65] : memref<1x32x32xf32, #tpu.memory_space<vmem>>, vector<1x32x32xf32>
    %133 = vector.shape_cast %132 : vector<1x32x32xf32> to vector<32x32xf32>
    %cst_66 = arith.constant dense<0.000000e+00> : vector<32x32xf32>
    %134 = tpu.matmul %4, %133, %cst_66 {dimension_numbers = #tpu.dot_dimension_numbers<[1], [0], [0], [1], [0, 0, 1, 1], [], []>} : vector<32x32xf32>, vector<32x32xf32>, vector<32x32xf32> -> vector<32x32xf32>
    %c0_67 = arith.constant 0 : index
    %c0_68 = arith.constant 0 : index
    %c0_69 = arith.constant 0 : index
    %135 = vector.load %arg16[%c0_67, %c0_68, %c0_69] : memref<1x1x32xf32, #tpu.memory_space<vmem>>, vector<1x1x32xf32>
    %136 = vector.shape_cast %135 : vector<1x1x32xf32> to vector<1x32xf32>
    %137 = vector.broadcast %136 : vector<1x32xf32> to vector<32x32xf32>
    %138 = arith.addf %134, %137 : vector<32x32xf32>
    %c0_70 = arith.constant 0 : index
    %c0_71 = arith.constant 0 : index
    %c0_72 = arith.constant 0 : index
    %139 = vector.load %arg14[%c0_70, %c0_71, %c0_72] : memref<1x32x32xf32, #tpu.memory_space<vmem>>, vector<1x32x32xf32>
    %140 = vector.shape_cast %139 : vector<1x32x32xf32> to vector<32x32xf32>
    %cst_73 = arith.constant dense<0.000000e+00> : vector<32x32xf32>
    %141 = tpu.matmul %4, %140, %cst_73 {dimension_numbers = #tpu.dot_dimension_numbers<[1], [0], [0], [1], [0, 0, 1, 1], [], []>} : vector<32x32xf32>, vector<32x32xf32>, vector<32x32xf32> -> vector<32x32xf32>
    %c0_74 = arith.constant 0 : index
    %c0_75 = arith.constant 0 : index
    %c0_76 = arith.constant 0 : index
    %142 = vector.load %arg17[%c0_74, %c0_75, %c0_76] : memref<1x1x32xf32, #tpu.memory_space<vmem>>, vector<1x1x32xf32>
    %143 = vector.shape_cast %142 : vector<1x1x32xf32> to vector<1x32xf32>
    %144 = vector.broadcast %143 : vector<1x32xf32> to vector<32x32xf32>
    %145 = arith.addf %141, %144 : vector<32x32xf32>
    %cst_77 = arith.constant 0.353553385 : f32
    %146 = vector.broadcast %cst_77 : f32 to vector<16x32xf32>
    %147 = arith.mulf %131, %146 : vector<16x32xf32>
    %148 = vector.shape_cast %147 : vector<16x32xf32> to vector<2x8x32xf32>
    %149 = vector.shape_cast %138 : vector<32x32xf32> to vector<2x16x32xf32>
    %150 = vector.shape_cast %145 : vector<32x32xf32> to vector<2x16x32xf32>
    %151 = vector.extract_strided_slice %148 {offsets = [0, 0, 0], sizes = [2, 8, 8], strides = [1, 1, 1]} : vector<2x8x32xf32> to vector<2x8x8xf32>
    %152 = vector.extract_strided_slice %149 {offsets = [0, 0, 0], sizes = [2, 16, 8], strides = [1, 1, 1]} : vector<2x16x32xf32> to vector<2x16x8xf32>
    %153 = vector.extract_strided_slice %150 {offsets = [0, 0, 0], sizes = [2, 16, 8], strides = [1, 1, 1]} : vector<2x16x32xf32> to vector<2x16x8xf32>
    "tpu.trace_start"() <{level = 10 : i32, message = "btd,bsd->bts"}> : () -> ()
    %cst_78 = arith.constant dense<0.000000e+00> : vector<2x8x16xf32>
    %154 = tpu.matmul %151, %152, %cst_78 {dimension_numbers = #tpu.dot_dimension_numbers<[2], [2], [1], [1], [0, 0, 0, 1, 1, 1], [0], [0]>} : vector<2x8x8xf32>, vector<2x16x8xf32>, vector<2x8x16xf32> -> vector<2x8x16xf32>
    "tpu.trace_stop"() : () -> ()
    %cst_79 = arith.constant dense<0xFF800000> : vector<2x8xf32>
    %155 = vector.multi_reduction <maximumf>, %154, %cst_79 [2] : vector<2x8x16xf32> to vector<2x8xf32>
    %156 = vector.shape_cast %155 : vector<2x8xf32> to vector<2x8x1xf32>
    %157 = vector.broadcast %156 : vector<2x8x1xf32> to vector<2x8x16xf32>
    %158 = arith.subf %154, %157 : vector<2x8x16xf32>
    %159 = math.exp %158 : vector<2x8x16xf32>
    %cst_80 = arith.constant dense<0.000000e+00> : vector<2x8xf32>
    %160 = vector.multi_reduction <add>, %159, %cst_80 [2] : vector<2x8x16xf32> to vector<2x8xf32>
    %161 = vector.shape_cast %160 : vector<2x8xf32> to vector<2x8x1xf32>
    %162 = tpu.reciprocal %161 {approx = true} : vector<2x8x1xf32> -> vector<2x8x1xf32>
    %163 = vector.broadcast %162 : vector<2x8x1xf32> to vector<2x8x16xf32>
    %164 = arith.mulf %159, %163 : vector<2x8x16xf32>
    "tpu.trace_start"() <{level = 10 : i32, message = "bts,bsd->btd"}> : () -> ()
    %cst_81 = arith.constant dense<0.000000e+00> : vector<2x8x8xf32>
    %165 = tpu.matmul %164, %153, %cst_81 {dimension_numbers = #tpu.dot_dimension_numbers<[2], [1], [1], [2], [0, 0, 0, 1, 1, 2], [0], [0]>} : vector<2x8x16xf32>, vector<2x16x8xf32>, vector<2x8x8xf32> -> vector<2x8x8xf32>
    "tpu.trace_stop"() : () -> ()
    %166 = vector.extract_strided_slice %148 {offsets = [0, 0, 8], sizes = [2, 8, 8], strides = [1, 1, 1]} : vector<2x8x32xf32> to vector<2x8x8xf32>
    %167 = vector.extract_strided_slice %149 {offsets = [0, 0, 8], sizes = [2, 16, 8], strides = [1, 1, 1]} : vector<2x16x32xf32> to vector<2x16x8xf32>
    %168 = vector.extract_strided_slice %150 {offsets = [0, 0, 8], sizes = [2, 16, 8], strides = [1, 1, 1]} : vector<2x16x32xf32> to vector<2x16x8xf32>
    "tpu.trace_start"() <{level = 10 : i32, message = "btd,bsd->bts"}> : () -> ()
    %cst_82 = arith.constant dense<0.000000e+00> : vector<2x8x16xf32>
    %169 = tpu.matmul %166, %167, %cst_82 {dimension_numbers = #tpu.dot_dimension_numbers<[2], [2], [1], [1], [0, 0, 0, 1, 1, 1], [0], [0]>} : vector<2x8x8xf32>, vector<2x16x8xf32>, vector<2x8x16xf32> -> vector<2x8x16xf32>
    "tpu.trace_stop"() : () -> ()
    %cst_83 = arith.constant dense<0xFF800000> : vector<2x8xf32>
    %170 = vector.multi_reduction <maximumf>, %169, %cst_83 [2] : vector<2x8x16xf32> to vector<2x8xf32>
    %171 = vector.shape_cast %170 : vector<2x8xf32> to vector<2x8x1xf32>
    %172 = vector.broadcast %171 : vector<2x8x1xf32> to vector<2x8x16xf32>
    %173 = arith.subf %169, %172 : vector<2x8x16xf32>
    %174 = math.exp %173 : vector<2x8x16xf32>
    %cst_84 = arith.constant dense<0.000000e+00> : vector<2x8xf32>
    %175 = vector.multi_reduction <add>, %174, %cst_84 [2] : vector<2x8x16xf32> to vector<2x8xf32>
    %176 = vector.shape_cast %175 : vector<2x8xf32> to vector<2x8x1xf32>
    %177 = tpu.reciprocal %176 {approx = true} : vector<2x8x1xf32> -> vector<2x8x1xf32>
    %178 = vector.broadcast %177 : vector<2x8x1xf32> to vector<2x8x16xf32>
    %179 = arith.mulf %174, %178 : vector<2x8x16xf32>
    "tpu.trace_start"() <{level = 10 : i32, message = "bts,bsd->btd"}> : () -> ()
    %cst_85 = arith.constant dense<0.000000e+00> : vector<2x8x8xf32>
    %180 = tpu.matmul %179, %168, %cst_85 {dimension_numbers = #tpu.dot_dimension_numbers<[2], [1], [1], [2], [0, 0, 0, 1, 1, 2], [0], [0]>} : vector<2x8x16xf32>, vector<2x16x8xf32>, vector<2x8x8xf32> -> vector<2x8x8xf32>
    "tpu.trace_stop"() : () -> ()
    %181 = vector.extract_strided_slice %148 {offsets = [0, 0, 16], sizes = [2, 8, 8], strides = [1, 1, 1]} : vector<2x8x32xf32> to vector<2x8x8xf32>
    %182 = vector.extract_strided_slice %149 {offsets = [0, 0, 16], sizes = [2, 16, 8], strides = [1, 1, 1]} : vector<2x16x32xf32> to vector<2x16x8xf32>
    %183 = vector.extract_strided_slice %150 {offsets = [0, 0, 16], sizes = [2, 16, 8], strides = [1, 1, 1]} : vector<2x16x32xf32> to vector<2x16x8xf32>
    "tpu.trace_start"() <{level = 10 : i32, message = "btd,bsd->bts"}> : () -> ()
    %cst_86 = arith.constant dense<0.000000e+00> : vector<2x8x16xf32>
    %184 = tpu.matmul %181, %182, %cst_86 {dimension_numbers = #tpu.dot_dimension_numbers<[2], [2], [1], [1], [0, 0, 0, 1, 1, 1], [0], [0]>} : vector<2x8x8xf32>, vector<2x16x8xf32>, vector<2x8x16xf32> -> vector<2x8x16xf32>
    "tpu.trace_stop"() : () -> ()
    %cst_87 = arith.constant dense<0xFF800000> : vector<2x8xf32>
    %185 = vector.multi_reduction <maximumf>, %184, %cst_87 [2] : vector<2x8x16xf32> to vector<2x8xf32>
    %186 = vector.shape_cast %185 : vector<2x8xf32> to vector<2x8x1xf32>
    %187 = vector.broadcast %186 : vector<2x8x1xf32> to vector<2x8x16xf32>
    %188 = arith.subf %184, %187 : vector<2x8x16xf32>
    %189 = math.exp %188 : vector<2x8x16xf32>
    %cst_88 = arith.constant dense<0.000000e+00> : vector<2x8xf32>
    %190 = vector.multi_reduction <add>, %189, %cst_88 [2] : vector<2x8x16xf32> to vector<2x8xf32>
    %191 = vector.shape_cast %190 : vector<2x8xf32> to vector<2x8x1xf32>
    %192 = tpu.reciprocal %191 {approx = true} : vector<2x8x1xf32> -> vector<2x8x1xf32>
    %193 = vector.broadcast %192 : vector<2x8x1xf32> to vector<2x8x16xf32>
    %194 = arith.mulf %189, %193 : vector<2x8x16xf32>
    "tpu.trace_start"() <{level = 10 : i32, message = "bts,bsd->btd"}> : () -> ()
    %cst_89 = arith.constant dense<0.000000e+00> : vector<2x8x8xf32>
    %195 = tpu.matmul %194, %183, %cst_89 {dimension_numbers = #tpu.dot_dimension_numbers<[2], [1], [1], [2], [0, 0, 0, 1, 1, 2], [0], [0]>} : vector<2x8x16xf32>, vector<2x16x8xf32>, vector<2x8x8xf32> -> vector<2x8x8xf32>
    "tpu.trace_stop"() : () -> ()
    %196 = vector.extract_strided_slice %148 {offsets = [0, 0, 24], sizes = [2, 8, 8], strides = [1, 1, 1]} : vector<2x8x32xf32> to vector<2x8x8xf32>
    %197 = vector.extract_strided_slice %149 {offsets = [0, 0, 24], sizes = [2, 16, 8], strides = [1, 1, 1]} : vector<2x16x32xf32> to vector<2x16x8xf32>
    %198 = vector.extract_strided_slice %150 {offsets = [0, 0, 24], sizes = [2, 16, 8], strides = [1, 1, 1]} : vector<2x16x32xf32> to vector<2x16x8xf32>
    "tpu.trace_start"() <{level = 10 : i32, message = "btd,bsd->bts"}> : () -> ()
    %cst_90 = arith.constant dense<0.000000e+00> : vector<2x8x16xf32>
    %199 = tpu.matmul %196, %197, %cst_90 {dimension_numbers = #tpu.dot_dimension_numbers<[2], [2], [1], [1], [0, 0, 0, 1, 1, 1], [0], [0]>} : vector<2x8x8xf32>, vector<2x16x8xf32>, vector<2x8x16xf32> -> vector<2x8x16xf32>
    "tpu.trace_stop"() : () -> ()
    %cst_91 = arith.constant dense<0xFF800000> : vector<2x8xf32>
    %200 = vector.multi_reduction <maximumf>, %199, %cst_91 [2] : vector<2x8x16xf32> to vector<2x8xf32>
    %201 = vector.shape_cast %200 : vector<2x8xf32> to vector<2x8x1xf32>
    %202 = vector.broadcast %201 : vector<2x8x1xf32> to vector<2x8x16xf32>
    %203 = arith.subf %199, %202 : vector<2x8x16xf32>
    %204 = math.exp %203 : vector<2x8x16xf32>
    %cst_92 = arith.constant dense<0.000000e+00> : vector<2x8xf32>
    %205 = vector.multi_reduction <add>, %204, %cst_92 [2] : vector<2x8x16xf32> to vector<2x8xf32>
    %206 = vector.shape_cast %205 : vector<2x8xf32> to vector<2x8x1xf32>
    %207 = tpu.reciprocal %206 {approx = true} : vector<2x8x1xf32> -> vector<2x8x1xf32>
    %208 = vector.broadcast %207 : vector<2x8x1xf32> to vector<2x8x16xf32>
    %209 = arith.mulf %204, %208 : vector<2x8x16xf32>
    "tpu.trace_start"() <{level = 10 : i32, message = "bts,bsd->btd"}> : () -> ()
    %cst_93 = arith.constant dense<0.000000e+00> : vector<2x8x8xf32>
    %210 = tpu.matmul %209, %198, %cst_93 {dimension_numbers = #tpu.dot_dimension_numbers<[2], [1], [1], [2], [0, 0, 0, 1, 1, 2], [0], [0]>} : vector<2x8x16xf32>, vector<2x16x8xf32>, vector<2x8x8xf32> -> vector<2x8x8xf32>
    "tpu.trace_stop"() : () -> ()
    %211 = tpu.concatenate %165, %180, %195, %210 in 2 : vector<2x8x8xf32>, vector<2x8x8xf32>, vector<2x8x8xf32>, vector<2x8x8xf32> -> vector<2x8x32xf32>
    %212 = vector.shape_cast %211 : vector<2x8x32xf32> to vector<16x32xf32>
    %c0_94 = arith.constant 0 : index
    %c0_95 = arith.constant 0 : index
    %c0_96 = arith.constant 0 : index
    %213 = vector.load %arg18[%c0_94, %c0_95, %c0_96] : memref<1x32x32xf32, #tpu.memory_space<vmem>>, vector<1x32x32xf32>
    %214 = vector.shape_cast %213 : vector<1x32x32xf32> to vector<32x32xf32>
    %cst_97 = arith.constant dense<0.000000e+00> : vector<16x32xf32>
    %215 = tpu.matmul %212, %214, %cst_97 {dimension_numbers = #tpu.dot_dimension_numbers<[1], [0], [0], [1], [0, 0, 1, 1], [], []>} : vector<16x32xf32>, vector<32x32xf32>, vector<16x32xf32> -> vector<16x32xf32>
    %c0_98 = arith.constant 0 : index
    %c0_99 = arith.constant 0 : index
    %c0_100 = arith.constant 0 : index
    %216 = vector.load %arg19[%c0_98, %c0_99, %c0_100] : memref<1x1x32xf32, #tpu.memory_space<vmem>>, vector<1x1x32xf32>
    %217 = vector.shape_cast %216 : vector<1x1x32xf32> to vector<1x32xf32>
    %218 = vector.broadcast %217 : vector<1x32xf32> to vector<16x32xf32>
    %219 = arith.addf %215, %218 : vector<16x32xf32>
    %220 = arith.addf %124, %219 : vector<16x32xf32>
    %221 = vector.extract_strided_slice %6 {offsets = [2, 0], sizes = [1, 32], strides = [1, 1]} : vector<6x32xf32> to vector<1x32xf32>
    %222 = vector.extract_strided_slice %6 {offsets = [3, 0], sizes = [1, 32], strides = [1, 1]} : vector<6x32xf32> to vector<1x32xf32>
    %cst_101 = arith.constant dense<0.000000e+00> : vector<16xf32>
    %223 = vector.multi_reduction <add>, %220, %cst_101 [1] : vector<16x32xf32> to vector<16xf32>
    %224 = vector.shape_cast %223 : vector<16xf32> to vector<16x1xf32>
    %cst_102 = arith.constant 3.200000e+01 : f32
    %225 = vector.broadcast %cst_102 : f32 to vector<16x1xf32>
    %226 = arith.divf %224, %225 : vector<16x1xf32>
    %227 = vector.broadcast %226 : vector<16x1xf32> to vector<16x32xf32>
    %228 = arith.subf %220, %227 : vector<16x32xf32>
    %229 = arith.mulf %228, %228 : vector<16x32xf32>
    %cst_103 = arith.constant dense<0.000000e+00> : vector<16xf32>
    %230 = vector.multi_reduction <add>, %229, %cst_103 [1] : vector<16x32xf32> to vector<16xf32>
    %231 = vector.shape_cast %230 : vector<16xf32> to vector<16x1xf32>
    %cst_104 = arith.constant 3.200000e+01 : f32
    %232 = vector.broadcast %cst_104 : f32 to vector<16x1xf32>
    %233 = arith.divf %231, %232 : vector<16x1xf32>
    %cst_105 = arith.constant 9.99999974E-6 : f32
    %234 = vector.broadcast %cst_105 : f32 to vector<16x1xf32>
    %235 = arith.addf %233, %234 : vector<16x1xf32>
    %236 = math.rsqrt %235 : vector<16x1xf32>
    %237 = vector.broadcast %236 : vector<16x1xf32> to vector<16x32xf32>
    %238 = arith.mulf %228, %237 : vector<16x32xf32>
    %239 = vector.broadcast %221 : vector<1x32xf32> to vector<16x32xf32>
    %240 = arith.mulf %238, %239 : vector<16x32xf32>
    %241 = vector.broadcast %222 : vector<1x32xf32> to vector<16x32xf32>
    %242 = arith.addf %240, %241 : vector<16x32xf32>
    %c0_106 = arith.constant 0 : index
    %c0_107 = arith.constant 0 : index
    %c0_108 = arith.constant 0 : index
    %243 = vector.load %arg21[%c0_106, %c0_107, %c0_108] : memref<1x32x64xf32, #tpu.memory_space<vmem>>, vector<1x32x64xf32>
    %244 = vector.shape_cast %243 : vector<1x32x64xf32> to vector<32x64xf32>
    %cst_109 = arith.constant dense<0.000000e+00> : vector<16x64xf32>
    %245 = tpu.matmul %242, %244, %cst_109 {dimension_numbers = #tpu.dot_dimension_numbers<[1], [0], [0], [1], [0, 0, 1, 1], [], []>} : vector<16x32xf32>, vector<32x64xf32>, vector<16x64xf32> -> vector<16x64xf32>
    %c0_110 = arith.constant 0 : index
    %c0_111 = arith.constant 0 : index
    %c0_112 = arith.constant 0 : index
    %246 = vector.load %arg22[%c0_110, %c0_111, %c0_112] : memref<1x1x64xf32, #tpu.memory_space<vmem>>, vector<1x1x64xf32>
    %247 = vector.shape_cast %246 : vector<1x1x64xf32> to vector<1x64xf32>
    %248 = vector.broadcast %247 : vector<1x64xf32> to vector<16x64xf32>
    %249 = arith.addf %245, %248 : vector<16x64xf32>
    %cst_113 = arith.constant 0.000000e+00 : f32
    %250 = vector.broadcast %cst_113 : f32 to vector<16x64xf32>
    %251 = arith.maximumf %249, %250 : vector<16x64xf32>
    %c0_114 = arith.constant 0 : index
    %c0_115 = arith.constant 0 : index
    %c0_116 = arith.constant 0 : index
    %252 = vector.load %arg23[%c0_114, %c0_115, %c0_116] : memref<1x64x32xf32, #tpu.memory_space<vmem>>, vector<1x64x32xf32>
    %253 = vector.shape_cast %252 : vector<1x64x32xf32> to vector<64x32xf32>
    %cst_117 = arith.constant dense<0.000000e+00> : vector<16x32xf32>
    %254 = tpu.matmul %251, %253, %cst_117 {dimension_numbers = #tpu.dot_dimension_numbers<[1], [0], [0], [1], [0, 0, 1, 1], [], []>} : vector<16x64xf32>, vector<64x32xf32>, vector<16x32xf32> -> vector<16x32xf32>
    %c0_118 = arith.constant 0 : index
    %c0_119 = arith.constant 0 : index
    %c0_120 = arith.constant 0 : index
    %255 = vector.load %arg24[%c0_118, %c0_119, %c0_120] : memref<1x1x32xf32, #tpu.memory_space<vmem>>, vector<1x1x32xf32>
    %256 = vector.shape_cast %255 : vector<1x1x32xf32> to vector<1x32xf32>
    %257 = vector.broadcast %256 : vector<1x32xf32> to vector<16x32xf32>
    %258 = arith.addf %254, %257 : vector<16x32xf32>
    %259 = arith.addf %242, %258 : vector<16x32xf32>
    %260 = vector.extract_strided_slice %6 {offsets = [4, 0], sizes = [1, 32], strides = [1, 1]} : vector<6x32xf32> to vector<1x32xf32>
    %261 = vector.extract_strided_slice %6 {offsets = [5, 0], sizes = [1, 32], strides = [1, 1]} : vector<6x32xf32> to vector<1x32xf32>
    %cst_121 = arith.constant dense<0.000000e+00> : vector<16xf32>
    %262 = vector.multi_reduction <add>, %259, %cst_121 [1] : vector<16x32xf32> to vector<16xf32>
    %263 = vector.shape_cast %262 : vector<16xf32> to vector<16x1xf32>
    %cst_122 = arith.constant 3.200000e+01 : f32
    %264 = vector.broadcast %cst_122 : f32 to vector<16x1xf32>
    %265 = arith.divf %263, %264 : vector<16x1xf32>
    %266 = vector.broadcast %265 : vector<16x1xf32> to vector<16x32xf32>
    %267 = arith.subf %259, %266 : vector<16x32xf32>
    %268 = arith.mulf %267, %267 : vector<16x32xf32>
    %cst_123 = arith.constant dense<0.000000e+00> : vector<16xf32>
    %269 = vector.multi_reduction <add>, %268, %cst_123 [1] : vector<16x32xf32> to vector<16xf32>
    %270 = vector.shape_cast %269 : vector<16xf32> to vector<16x1xf32>
    %cst_124 = arith.constant 3.200000e+01 : f32
    %271 = vector.broadcast %cst_124 : f32 to vector<16x1xf32>
    %272 = arith.divf %270, %271 : vector<16x1xf32>
    %cst_125 = arith.constant 9.99999974E-6 : f32
    %273 = vector.broadcast %cst_125 : f32 to vector<16x1xf32>
    %274 = arith.addf %272, %273 : vector<16x1xf32>
    %275 = math.rsqrt %274 : vector<16x1xf32>
    %276 = vector.broadcast %275 : vector<16x1xf32> to vector<16x32xf32>
    %277 = arith.mulf %267, %276 : vector<16x32xf32>
    %278 = vector.broadcast %260 : vector<1x32xf32> to vector<16x32xf32>
    %279 = arith.mulf %277, %278 : vector<16x32xf32>
    %280 = vector.broadcast %261 : vector<1x32xf32> to vector<16x32xf32>
    %281 = arith.addf %279, %280 : vector<16x32xf32>
    %c0_126 = arith.constant 0 : index
    %c0_127 = arith.constant 0 : index
    %282 = vector.load %arg26[%c0_126, %c0_127] : memref<16x32xf32, #tpu.memory_space<vmem>>, vector<16x32xf32>
    tpu.vector_store %arg26[%c0_126, %c0_127], %281 {strides = array<i32>} : memref<16x32xf32, #tpu.memory_space<vmem>>, vector<16x32xf32>,
    %c0_128 = arith.constant 0 : index
    %c0_129 = arith.constant 0 : index
    %283 = vector.load %arg25[%c0_128, %c0_129] : memref<16x32xf32, #tpu.memory_space<vmem>>, vector<16x32xf32>
    tpu.vector_store %arg25[%c0_128, %c0_129], %281 {strides = array<i32>} : memref<16x32xf32, #tpu.memory_space<vmem>>, vector<16x32xf32>,
    return
  }
  func.func @transform_0(%arg0: i32, %arg1: i32) -> (i32, i32) {
    %c0_i32 = arith.constant 0 : i32
    %c0_i32_0 = arith.constant 0 : i32
    return %arg0, %c0_i32 : i32, i32
  }
  func.func @transform_1(%arg0: i32, %arg1: i32) -> (i32, i32) {
    %c0_i32 = arith.constant 0 : i32
    %c0_i32_0 = arith.constant 0 : i32
    return %arg0, %c0_i32 : i32, i32
  }
  func.func @transform_2(%arg0: i32, %arg1: i32) -> (i32, i32, i32) {
    %c0_i32 = arith.constant 0 : i32
    %c0_i32_0 = arith.constant 0 : i32
    %c0_i32_1 = arith.constant 0 : i32
    return %arg1, %c0_i32, %c0_i32_0 : i32, i32, i32
  }
  func.func @transform_3(%arg0: i32, %arg1: i32) -> (i32, i32, i32) {
    %c0_i32 = arith.constant 0 : i32
    %c0_i32_0 = arith.constant 0 : i32
    %c0_i32_1 = arith.constant 0 : i32
    return %arg1, %c0_i32, %c0_i32_0 : i32, i32, i32
  }
  func.func @transform_4(%arg0: i32, %arg1: i32) -> (i32, i32, i32) {
    %c0_i32 = arith.constant 0 : i32
    %c0_i32_0 = arith.constant 0 : i32
    %c0_i32_1 = arith.constant 0 : i32
    return %arg1, %c0_i32, %c0_i32_0 : i32, i32, i32
  }
  func.func @transform_5(%arg0: i32, %arg1: i32) -> (i32, i32, i32) {
    %c0_i32 = arith.constant 0 : i32
    %c0_i32_0 = arith.constant 0 : i32
    %c0_i32_1 = arith.constant 0 : i32
    return %arg1, %c0_i32, %c0_i32_0 : i32, i32, i32
  }
  func.func @transform_6(%arg0: i32, %arg1: i32) -> (i32, i32, i32) {
    %c0_i32 = arith.constant 0 : i32
    %c0_i32_0 = arith.constant 0 : i32
    %c0_i32_1 = arith.constant 0 : i32
    return %arg1, %c0_i32, %c0_i32_0 : i32, i32, i32
  }
  func.func @transform_7(%arg0: i32, %arg1: i32) -> (i32, i32, i32) {
    %c0_i32 = arith.constant 0 : i32
    %c0_i32_0 = arith.constant 0 : i32
    %c0_i32_1 = arith.constant 0 : i32
    return %arg1, %c0_i32, %c0_i32_0 : i32, i32, i32
  }
  func.func @transform_8(%arg0: i32, %arg1: i32) -> (i32, i32, i32) {
    %c0_i32 = arith.constant 0 : i32
    %c0_i32_0 = arith.constant 0 : i32
    %c0_i32_1 = arith.constant 0 : i32
    return %arg1, %c0_i32, %c0_i32_0 : i32, i32, i32
  }
  func.func @transform_9(%arg0: i32, %arg1: i32) -> (i32, i32, i32) {
    %c0_i32 = arith.constant 0 : i32
    %c0_i32_0 = arith.constant 0 : i32
    %c0_i32_1 = arith.constant 0 : i32
    return %arg1, %c0_i32, %c0_i32_0 : i32, i32, i32
  }
  func.func @transform_10(%arg0: i32, %arg1: i32) -> (i32, i32, i32) {
    %c0_i32 = arith.constant 0 : i32
    %c0_i32_0 = arith.constant 0 : i32
    %c0_i32_1 = arith.constant 0 : i32
    return %arg1, %c0_i32, %c0_i32_0 : i32, i32, i32
  }
  func.func @transform_11(%arg0: i32, %arg1: i32) -> (i32, i32, i32) {
    %c0_i32 = arith.constant 0 : i32
    %c0_i32_0 = arith.constant 0 : i32
    %c0_i32_1 = arith.constant 0 : i32
    return %arg1, %c0_i32, %c0_i32_0 : i32, i32, i32
  }
  func.func @transform_12(%arg0: i32, %arg1: i32) -> (i32, i32, i32) {
    %c0_i32 = arith.constant 0 : i32
    %c0_i32_0 = arith.constant 0 : i32
    %c0_i32_1 = arith.constant 0 : i32
    return %arg1, %c0_i32, %c0_i32_0 : i32, i32, i32
  }
  func.func @transform_13(%arg0: i32, %arg1: i32) -> (i32, i32, i32) {
    %c0_i32 = arith.constant 0 : i32
    %c0_i32_0 = arith.constant 0 : i32
    %c0_i32_1 = arith.constant 0 : i32
    return %arg1, %c0_i32, %c0_i32_0 : i32, i32, i32
  }
  func.func @transform_14(%arg0: i32, %arg1: i32) -> (i32, i32, i32) {
    %c0_i32 = arith.constant 0 : i32
    %c0_i32_0 = arith.constant 0 : i32
    %c0_i32_1 = arith.constant 0 : i32
    return %arg1, %c0_i32, %c0_i32_0 : i32, i32, i32
  }
  func.func @transform_15(%arg0: i32, %arg1: i32) -> (i32, i32, i32) {
    %c0_i32 = arith.constant 0 : i32
    %c0_i32_0 = arith.constant 0 : i32
    %c0_i32_1 = arith.constant 0 : i32
    return %arg1, %c0_i32, %c0_i32_0 : i32, i32, i32
  }
  func.func @transform_16(%arg0: i32, %arg1: i32) -> (i32, i32, i32) {
    %c0_i32 = arith.constant 0 : i32
    %c0_i32_0 = arith.constant 0 : i32
    %c0_i32_1 = arith.constant 0 : i32
    return %arg1, %c0_i32, %c0_i32_0 : i32, i32, i32
  }
  func.func @transform_17(%arg0: i32, %arg1: i32) -> (i32, i32, i32) {
    %c0_i32 = arith.constant 0 : i32
    %c0_i32_0 = arith.constant 0 : i32
    %c0_i32_1 = arith.constant 0 : i32
    return %arg1, %c0_i32, %c0_i32_0 : i32, i32, i32
  }
  func.func @transform_18(%arg0: i32, %arg1: i32) -> (i32, i32, i32) {
    %c0_i32 = arith.constant 0 : i32
    %c0_i32_0 = arith.constant 0 : i32
    %c0_i32_1 = arith.constant 0 : i32
    return %arg1, %c0_i32, %c0_i32_0 : i32, i32, i32
  }
  func.func @transform_19(%arg0: i32, %arg1: i32) -> (i32, i32, i32) {
    %c0_i32 = arith.constant 0 : i32
    %c0_i32_0 = arith.constant 0 : i32
    %c0_i32_1 = arith.constant 0 : i32
    return %arg1, %c0_i32, %c0_i32_0 : i32, i32, i32
  }
  func.func @transform_20(%arg0: i32, %arg1: i32) -> (i32, i32, i32) {
    %c0_i32 = arith.constant 0 : i32
    %c0_i32_0 = arith.constant 0 : i32
    %c0_i32_1 = arith.constant 0 : i32
    return %arg1, %c0_i32, %c0_i32_0 : i32, i32, i32
  }
  func.func @transform_21(%arg0: i32, %arg1: i32) -> (i32, i32, i32) {
    %c0_i32 = arith.constant 0 : i32
    %c0_i32_0 = arith.constant 0 : i32
    %c0_i32_1 = arith.constant 0 : i32
    return %arg1, %c0_i32, %c0_i32_0 : i32, i32, i32
  }
  func.func @transform_22(%arg0: i32, %arg1: i32) -> (i32, i32, i32) {
    %c0_i32 = arith.constant 0 : i32
    %c0_i32_0 = arith.constant 0 : i32
    %c0_i32_1 = arith.constant 0 : i32
    return %arg1, %c0_i32, %c0_i32_0 : i32, i32, i32
  }
  func.func @transform_23(%arg0: i32, %arg1: i32) -> (i32, i32) {
    %c0_i32 = arith.constant 0 : i32
    %c0_i32_0 = arith.constant 0 : i32
    return %arg0, %c0_i32 : i32, i32
  }
}

</mosaic_0001>

<bundles_post_ra>
// kernel: tpu_custom_call.1
= control target key start
LH: loop header
LB: loop body
LE: loop exit
PB: predicated region body
PF: predicated region fallthrough
CT: control target
= control target key end

     0   :  { %s4850_s0 = inlined_call_operand.vmem [shape: f32[16,32], index: 0, kind: input, shape index: {}]   ;;  %s4851_s1 = inlined_call_operand.hbm [shape: f32[32,32], index: 1, kind: input, shape index: {}]   ;;  %s4852_s2 = inlined_call_operand.vmem [shape: f32[2,32,32], index: 2, kind: input, shape index: {}]   ;;  %s4853_s3 = inlined_call_operand.vmem [shape: f32[2,32,32], index: 3, kind: input, shape index: {}]   ;;  %s4854_s4 = inlined_call_operand.vmem [shape: f32[2,32,32], index: 4, kind: input, shape index: {}]   ;;  %s4855_s5 = inlined_call_operand.vmem [shape: f32[2,1,32], index: 5, kind: input, shape index: {}]   ;;  %s4856_s6 = inlined_call_operand.vmem [shape: f32[2,1,32], index: 6, kind: input, shape index: {}]   ;;  %s4857_s7 = inlined_call_operand.vmem [shape: f32[2,1,32], index: 7, kind: input, shape index: {}]   ;;  %s4858_s8 = inlined_call_operand.hbm [shape: f32[2,32,32], index: 8, kind: input, shape index: {}]   ;;  %s4859_s9 = inlined_call_operand.vmem [shape: f32[2,1,32], index: 9, kind: input, shape index: {}]   ;;  %s4860_s10 = inlined_call_operand.hbm [shape: f32[2,32,32], index: 10, kind: input, shape index: {}]   ;;  %s4861_s11 = inlined_call_operand.hbm [shape: f32[2,32,32], index: 11, kind: input, shape index: {}]   ;;  %s4862_s12 = inlined_call_operand.hbm [shape: f32[2,32,32], index: 12, kind: input, shape index: {}]   ;;  %s4863_s13 = inlined_call_operand.vmem [shape: f32[2,1,32], index: 13, kind: input, shape index: {}]   ;;  %s4864_s14 = inlined_call_operand.vmem [shape: f32[2,1,32], index: 14, kind: input, shape index: {}]   ;;  %s4865_s15 = inlined_call_operand.vmem [shape: f32[2,1,32], index: 15, kind: input, shape index: {}]   ;;  %s4866_s16 = inlined_call_operand.hbm [shape: f32[2,32,32], index: 16, kind: input, shape index: {}]   ;;  %s4867_s17 = inlined_call_operand.vmem [shape: f32[2,1,32], index: 17, kind: input, shape index: {}]   ;;  %s4868_s18 = inlined_call_operand.vmem [shape: f32[2,6,32], index: 18, kind: input, shape index: {}]   ;;  %s4869_s19 = inlined_call_operand.hbm [shape: f32[2,32,64], index: 19, kind: input, shape index: {}]   ;;  %s4870_s20 = inlined_call_operand.hbm [shape: f32[2,1,64], index: 20, kind: input, shape index: {}]   ;;  %s4871_s21 = inlined_call_operand.vmem [shape: f32[2,64,32], index: 21, kind: input, shape index: {}]   ;;  %s4872_s22 = inlined_call_operand.vmem [shape: f32[2,1,32], index: 22, kind: input, shape index: {}]   ;;  %s4873_s23 = inlined_call_operand.hbm [shape: f32[16,32], index: 23, kind: output, shape index: {}]  }
   0x1   :  { %4888 = sst [smem:[#allocation35_spill]] %s4850_s0 }
   0x2   :  { %4889 = sst [smem:[#allocation36_spill]] %s4851_s1 }
   0x3   :  { %4890 = sst [smem:[#allocation37_spill]] %s4852_s2 }
   0x4   :  { %4891 = sst [smem:[#allocation38_spill]] %s4853_s3 }
   0x5   :  { %4892 = sst [smem:[#allocation39_spill]] %s4854_s4 }
   0x6   :  { %4893 = sst [smem:[#allocation40_spill]] %s4855_s5 }
   0x7   :  { %4894 = sst [smem:[#allocation41_spill]] %s4856_s6 }
   0x8   :  { %4895 = sst [smem:[#allocation42_spill]] %s4857_s7 }
   0x9   :  { %4896 = sst [smem:[#allocation43_spill]] %s4858_s8 }
   0xa   :  { %4897 = sst [smem:[#allocation44_spill]] %s4860_s10 }
   0xb   :  { %4898 = sst [smem:[#allocation45_spill]] %s4861_s11 }
   0xc   :  { %4899 = sst [smem:[#allocation46_spill]] %s4862_s12 }
   0xd   :  { %4900 = sst [smem:[#allocation47_spill]] %s4865_s15 }
   0xe   :  { %4901 = sst [smem:[#allocation48_spill]] %s4866_s16 }
   0xf   :  { %4902 = sst [smem:[#allocation49_spill]] %s4867_s17 }
  0x10   :  { %4903 = sst [smem:[#allocation50_spill]] %s4868_s18 }
  0x11   :  { %4904 = sst [smem:[#allocation51_spill]] %s4869_s19 }
  0x12   :  { %4905 = sst [smem:[#allocation52_spill]] %s4870_s20 }
  0x13   :  { %4906 = sst [smem:[#allocation53_spill]] %s4871_s21 }
  0x14   :  { %4907 = sst [smem:[#allocation54_spill]] %s4872_s22 }
  0x15   :  { %4908 = sst [smem:[#allocation55_spill]] %s4873_s23 }
  0x16   :  { %28 = vsyncpa [#allocation4], 0 }
  0x17   :  { %29 = vsyncpa [#allocation7], 0 }
  0x18   :  { %31 = vsyncpa [#allocation7 + $0x1], 0 }
  0x19   :  { %32 = vsyncpa [#allocation10], 0 }
  0x1a   :  { %34 = vsyncpa [#allocation10 + $0x1], 0 }
  0x1b   :  { %35 = vsyncpa [#allocation13], 0 }
  0x1c   :  { %37 = vsyncpa [#allocation13 + $0x1], 0 }
  0x1d   :  { %38 = vsyncpa [#allocation16], 0 }
  0x1e   :  { %40 = vsyncpa [#allocation16 + $0x1], 0 }
  0x1f   :  { %41 = vsyncpa [#allocation5], 0  ;;  %s4159_s4 = smov 0   ;;  %s4161_s30 = smov 0  }
  0x20   :  { %s4163_s24 = smov 0   ;;  %s4165_s25 = smov 0  }
  0x21   :  { %s4167_s5 = smov 0   ;;  %s4169_s1 = smov 0  }
  0x22 LB: > { %4909 = sst [smem:[#allocation24_spill]] %s4009_s30  ;;  %s56_s26 = sadd.s32 1, %s4021_s5  ;;  %s4025_s1 = sphi %s4169_s1, %s47_s1   ;;  %s4021_s5 = sphi %s4167_s5, %s4971_s5   ;;  %s4017_s25 = sphi %s4165_s25, %s4970_s25   ;;  %s4013_s24 = sphi %s4163_s24, %s4969_s24   ;;  %s4009_s30 = sphi %s4161_s30, %s4968_s30   ;;  %s4005_s4 = sphi %s4159_s4, %s4967_s4  }
  0x23   : > { %4910 = sst [smem:[#allocation25_spill]] %s4013_s24  ;;  %s274_s2 = sadd.s32 1, %s4013_s24 }
  0x24   : > { %4911 = sst [smem:[#allocation26_spill]] %s4021_s5  ;;  %p57_p0 = scmp.ge.s32.totalorder %s56_s26, 2 }
  0x25   : > { %4912 = sst [smem:[#allocation27_spill]] %s4025_s1  ;;  %p281_p1 = scmp.ne.s32.totalorder %s4013_s24, %s4009_s30 }
  0x26   : > { %p282_p2 = scmp.eq.s32.totalorder %s4025_s1, 0  ;;  %s4973_s26 = smov (%p57_p0, %s56_s26), 0 }
  0x27   : > { %4913 = sst [smem:[#allocation28_spill]] %s4973_s26  ;;  %s271_s27 = ssub.s32 %s4021_s5, %s4973_s26 }
  0x28   : > { %p4196_p3 = por %p282_p2, %p281_p1  ;;  %p272_p4 = scmp.eq.s32.totalorder %s271_s27, 0 }
  0x29   : > { %p3500_p5 = scmp.lt.s32.totalorder %s4025_s1, 2  ;;  %s4204_s7 = sand.u32 1, %s4025_s1  }
  0x2a   : > { %s4207_s28 = sand.u32 1, %s4013_s24   ;;  %s4216_s0 = sshll.u32 %s4021_s5, 5 }
  0x2b   : > { %s4210_s29 = scalar_select %p272_p4, %s4013_s24, %s274_s2  }
  0x2c   : > { %s4213_s3 = sshll.u32 %s4207_s28, 5  ;;  %s4916_s8 = sld [smem:[#allocation43_spill]] }
  0x2d   : > { %4915 = sst [smem:[#allocation29_spill]] %s4210_s29  ;;  %s773_s22 = scalar_lea.vmem [#allocation6], %s4213_s3 }
  0x2e   : > { %s781_s21 = sshll.u32 %s773_s22, 4  ;;  %p4225_p6 = pnand %p3500_p5, %p4196_p3  ;;  %s782_s21 = int_to_ptr.vmem [resolvable:$true] %s781_s21 }
  0x2f   : > { %s4918_s11 = sld [smem:[#allocation45_spill]]  ;;  %s4877_s26 = scalar_lea.sflag [#allocation7], %s4204_s7 }
  0x30   : > { %s4028_s22 = smov 8   ;;  %s823_s24 = scalar_lea.vmem [#allocation9], %s4213_s3 }
  0x31   : > { %s831_s29 = sshll.u32 %s823_s24, 4  ;;  %s4919_s16 = sld [smem:[#allocation48_spill]]  ;;  %s832_s29 = int_to_ptr.vmem [resolvable:$true] %s831_s29 }
  0x32   : > { %s778_s27 = scalar_lea.hbm %s4916_s8, %s4216_s0  ;;  %s4027_s8 = smov 128  }
  0x33   : > { %s779_s18 = sshll.u32 %s778_s27, 4  ;;  %s4879_s27 = scalar_lea.sflag [#allocation10], %s4204_s7  ;;  %s780_s18 = int_to_ptr.hbm [resolvable:$true] %s779_s18 }
  0x34   : > { %3480 = dma.hbm_to_vmem [thread:$0]  (!%p4225_p6), %s780_s18, 512, %s782_s21, %s4877_s26, %s4027_s8, %s4027_s8, %s4028_s22  }
  0x35   : > { %s828_s23 = scalar_lea.hbm %s4918_s11, %s4216_s0  ;;  %s885_s21 = scalar_lea.vmem [#allocation12], %s4213_s3 }
  0x36   : > { %s829_s6 = sshll.u32 %s828_s23, 4  ;;  %s893_s23 = sshll.u32 %s885_s21, 4  ;;  %s830_s6 = int_to_ptr.hbm [resolvable:$true] %s829_s6  ;;  %s894_s23 = int_to_ptr.vmem [resolvable:$true] %s893_s23 }
  0x37   : > { %3486 = dma.hbm_to_vmem [thread:$0]  (!%p4225_p6), %s830_s6, 512, %s832_s29, %s4879_s27, %s4027_s8, %s4027_s8, %s4028_s22  }
  0x38   : > { %s890_s18 = scalar_lea.hbm %s4919_s16, %s4216_s0  ;;  %s4878_s24 = scalar_lea.sflag [#allocation13], %s4204_s7 }
  0x39   : > { %s891_s26 = sshll.u32 %s890_s18, 4  ;;  %s4264_s15 = sadd.s32 4294967295, %s4025_s1   ;;  %s892_s26 = int_to_ptr.hbm [resolvable:$true] %s891_s26 }
  0x3a   : > { %3492 = dma.hbm_to_vmem [thread:$0]  (!%p4225_p6), %s892_s26, 512, %s894_s23, %s4878_s24, %s4027_s8, %s4027_s8, %s4028_s22  }
  0x3b   : > { %4920 = sst [smem:[#allocation30_spill]] %s4264_s15  ;;  %p287_p7 = scmp.ne.s32.totalorder %s4009_s30, %s4005_s4 }
  0x3c   : > { %p288_p8 = scmp.eq.s32.totalorder %s4264_s15, 0  ;;  %p3317_p9 = scmp.ge.s32.totalorder %s4025_s1, 1 }
  0x3d   : > { %p688_p10 = scmp.lt.s32.totalorder %s4025_s1, 3  ;;  %s4923_s29 = sld [smem:[#allocation36_spill]] }
  0x3e   : > { %p4273_p11 = por %p288_p8, %p287_p7  ;;  %s4029_s18 = smov [#allocation3]  }
  0x3f   : > { %p4277_p12 = pnand %p3317_p9, %p688_p10  ;;  %s713_s21 = sshll.u32 %s4029_s18, 4  ;;  %s714_s21 = int_to_ptr.vmem [resolvable:$true] %s713_s21 }
  0x40   : > { %s4924_s10 = sld [smem:[#allocation44_spill]]  ;;  %s801_s6 = scalar_lea.vmem [#allocation8], %s4213_s3 }
  0x41   : > { %p3473_p13 = pneg %p4277_p12  ;;  %s4925_s18 = scalar_lea.sflag [#allocation7], %s4204_s7 }
  0x42   : > { %s4926_s12 = sld [smem:[#allocation46_spill]] }
  0x43   : > { %s711_s4 = sshll.u32 %s4923_s29, 4  ;;  %p3474_p0 = pnand %p3473_p13, %p288_p8  ;;  %s712_s4 = int_to_ptr.hbm [resolvable:$true] %s711_s4 }
  0x44   : > { %s809_s29 = sshll.u32 %s801_s6, 4  ;;  %s845_s6 = scalar_lea.vmem [#allocation11], %s4213_s3  ;;  %s810_s29 = int_to_ptr.vmem [resolvable:$true] %s809_s29 }
  0x45   : > { %3476 = dma.hbm_to_vmem [thread:$0]  (!%p3474_p0), %s712_s4, 512, %s714_s21, [#allocation4], %s4027_s8, %s4027_s8, %s4028_s22  }
  0x46   : > { %s806_s27 = scalar_lea.hbm %s4924_s10, %s4216_s0  ;;  %s853_s10 = sshll.u32 %s845_s6, 4  ;;  %s854_s10 = int_to_ptr.vmem [resolvable:$true] %s853_s10 }
  0x47   : > { %s807_s26 = sshll.u32 %s806_s27, 4  ;;  %s4927_s4 = scalar_lea.sflag [#allocation10], %s4204_s7  ;;  %s808_s26 = int_to_ptr.hbm [resolvable:$true] %s807_s26 }
  0x48   : > { %3483 = dma.hbm_to_vmem [thread:$0]  (!%p4225_p6), %s808_s26, 512, %s810_s29, %s4925_s18, %s4027_s8, %s4027_s8, %s4028_s22  }
  0x49   : > { %s850_s27 = scalar_lea.hbm %s4926_s12, %s4216_s0  ;;  %s4928_s19 = sld [smem:[#allocation51_spill]] }
  0x4a   : > { %s851_s16 = sshll.u32 %s850_s27, 4  ;;  %s920_s18 = scalar_lea.vmem [#allocation14], %s4213_s3  ;;  %s852_s16 = int_to_ptr.hbm [resolvable:$true] %s851_s16 }
  0x4b   : > { %3489 = dma.hbm_to_vmem [thread:$0]  (!%p4225_p6), %s852_s16, 512, %s854_s10, %s4927_s4, %s4027_s8, %s4027_s8, %s4028_s22  }
  0x4c   : > { %s928_s24 = sshll.u32 %s920_s18, 4  ;;  %s4929_s27 = scalar_lea.sflag [#allocation13], %s4204_s7  ;;  %s929_s24 = int_to_ptr.vmem [resolvable:$true] %s928_s24 }
  0x4d   : > { %s4930_s20 = sld [smem:[#allocation52_spill]]  ;;  %s941_s16 = scalar_lea.vmem [#allocation15], %s4207_s28 }
  0x4e   : > { %s948_s4 = sshll.u32 %s941_s16, 4  ;;  %s939_s3 = scalar_lea.sflag [#allocation16], %s4207_s28  ;;  %s949_s4 = int_to_ptr.vmem [resolvable:$true] %s948_s4 }
  0x4f   : > { %s925_s29 = scalar_lea.hbm %s4928_s19, %s4216_s0 }
  0x50   : > { %s926_s23 = sshll.u32 %s925_s29, 4  ;;  %s927_s23 = int_to_ptr.hbm [resolvable:$true] %s926_s23 }
  0x51   : > { %3495 = dma.hbm_to_vmem [thread:$0]  (!%p4225_p6), %s927_s23, 512, %s929_s24, %s4929_s27, %s4027_s8, %s4027_s8, %s4028_s22  }
  0x52   : > { %971 = sbr.rel (%p4277_p12) target bundleno = 3608 (0xe18), region = 112 }
  0x53   : > { %s944_s1 = scalar_lea.hbm %s4930_s20, %s4021_s5 }
  0x54   : > { %s946_s10 = sshll.u32 %s944_s1, 4  ;;  %s947_s10 = int_to_ptr.hbm [resolvable:$true] %s946_s10 }
  0x55   : > { %3498 = dma.hbm_to_vmem [thread:$0]  (!%p4225_p6), %s947_s10, 16, %s949_s4, %s939_s3  }
  0x57   : > { %3980 = dma.done.wait (%p288_p8), [#allocation4], 512  }
  0x58   : > { %3982 = vsyncadd (%p288_p8), [#allocation4], 4294966784  ;;  %s978_s8 = sand.u32 1, %s4264_s15   ;;  %s4343_s12 = sand.u32 1, %s4009_s30  }
  0x59   : > { %4931 = sst [smem:[#allocation31_spill]] %s4343_s12  ;;  %s3341_s1 = sshll.u32 %s4343_s12, 5 }
  0x5a   : > { %s979_s7 = scalar_lea.sflag [#allocation7], %s978_s8  ;;  %s4346_s28 = scalar_lea.vmem [#allocation6], %s3341_s1 }
  0x5b   : > { %3984 = dma.done.wait (%p4273_p11), %s979_s7, 1024  }
  0x5c   : > { %3986 = vsyncadd (%p4273_p11), %s979_s7, 4294966272  ;;  %s4352_s0 = scalar_lea.vmem [#allocation8], %s3341_s1  ;;  %s999_s2 = scalar_lea.sflag [#allocation10], %s978_s8 }
  0x5d   : > { %s4354_s22 = scalar_lea.vmem [#allocation9], %s3341_s1 }
  0x5e   : > { %3988 = dma.done.wait (%p4273_p11), %s999_s2, 1024  }
  0x5f   : > { %3990 = vsyncadd (%p4273_p11), %s999_s2, 4294966272  ;;  %s4360_s17 = scalar_lea.vmem [#allocation11], %s3341_s1  ;;  %s1019_s21 = scalar_lea.sflag [#allocation13], %s978_s8 }
  0x60   : > { %4932 = sst [smem:[#allocation32_spill]] %s4360_s17  ;;  %s4362_s26 = scalar_lea.vmem [#allocation12], %s3341_s1 }
  0x61   : > { %4933 = sst [smem:[#allocation33_spill]] %s4362_s26 }
  0x62   : > { %3992 = dma.done.wait (%p4273_p11), %s1019_s21, 1024  }
  0x63   : > { %3994 = vsyncadd (%p4273_p11), %s1019_s21, 4294966272  ;;  %s4368_s29 = scalar_lea.vmem [#allocation14], %s3341_s1  ;;  %s1039_s18 = scalar_lea.sflag [#allocation16], %s4343_s12 }
  0x64   : > { %4934 = sst [smem:[#allocation34_spill]] %s4368_s29 }
  0x65   : > { %3996 = dma.done.wait (%p4273_p11), %s1039_s18, 16  }
  0x66   : > { %3998 = vsyncadd (%p4273_p11), %s1039_s18, 4294967280  ;;  %p1192_p1 = scmp.lt.s32.totalorder %s4017_s25, 1  ;;  %s4936_s8 = sld [smem:[#allocation37_spill]] }
  0x67   : > { %s4937_s21 = sld [smem:[#allocation38_spill]]  ;;  %p3356_p2 = scmp.ne.s32.totalorder %s4017_s25, 0 }
  0x68   : > { %s4378_s23 = scalar_select %p1192_p1, %s4017_s25, 1 }
  0x69   : > { %s4938_s20 = sld [smem:[#allocation39_spill]] }
  0x6a   : > { %s3447_s27 = sshll.u32 %s4378_s23, 5  ;;  %s4941_s15 = sld [smem:[#allocation47_spill]] }
  0x6b   : > { %s4942_s16 = sld [smem:[#allocation49_spill]]  ;;  %s3353_s10 = sshll.u32 %s4378_s23, 3 }
  0x6c   : > { %s4388_s1 = scalar_lea.vmem %s4936_s8, %s3447_s27  ;;  %s3450_s4 = sshll.u32 %s4378_s23, 6 }
  0x6d   : > { %s4393_s18 = scalar_lea.vmem %s4937_s21, %s3447_s27  ;;  %s4943_s29 = sld [smem:[#allocation50_spill]] }
  0x6e   : > { %s4944_s21 = sld [smem:[#allocation53_spill]] }
  0x6f   : > { %s4398_s5 = scalar_lea.vmem %s4938_s20, %s3447_s27  ;;  %s4945_s24 = sld [smem:[#allocation54_spill]] }
  0x70   : > { %s1227_s30 = scalar_lea.vmem %s4941_s15, %s4378_s23  ;;  %s4946_s6 = sld [smem:[#allocation35_spill]] (!%p3356_p2) }
  0x71   : > { %s1230_s12 = scalar_lea.vmem %s4942_s16, %s4378_s23  ;;  %1247 = sbr.rel (%p3356_p2) target bundleno = 121 (0x79), region = 148 }
  0x73   : > { %s4433_s17 = scalar_lea.vmem %s4943_s29, %s3353_s10 }
  0x74   : > { %s4438_s26 = scalar_lea.vmem %s4944_s21, %s3450_s4 }
  0x75   : > { %s1242_s27 = scalar_lea.vmem %s4945_s24, %s4378_s23 }
  0x76   : > { %v1248_v0 = vld [vmem:[%s4946_s6] sm:$0xff]  ;;  %vm1250_vm0 = vcmask 261120   ;;  %v1249_v1 = vld [vmem:[%s4946_s6 + $0x8] sm:$0xff] }
  0x77   : > { %1251 = vst.msk [vmem:[#allocation2] sm:$0xff] %vm1250_vm0, %v1248_v0 }
  0x78   : > { %1252 = vst.msk [vmem:[#allocation2 + $0x8] sm:$0xff] %vm1250_vm0, %v1249_v1 }
  0x79 PF: > { %v1301_v2 = vld [vmem:[%s4393_s18 + $0x18] sm:$0xff]  ;;  %v1300_v4 = vld [vmem:[%s4393_s18 + $0x10] sm:$0xff]  ;;  %v1299_v6 = vld [vmem:[%s4393_s18 + $0x8] sm:$0xff]  ;;  %vm1268_vm1 = vcmask 261120   ;;  %s4949_s10 = sld [smem:[#allocation40_spill]]  ;;  %vm1362_vm2 = vcmask 64512   ;;  %s4956_s20 = scalar_lea.vmem %s4863_s13, %s4378_s23 }
  0x7a   : > { %v1263_v3 = vld [vmem:[%s4388_s1 + $0x18] sm:$0xff]  ;;  %1318 = vmatpush.msra.mxu1 %v1301_v2  ;;  %v1262_v5 = vld [vmem:[%s4388_s1 + $0x10] sm:$0xff]  ;;  %v1261_v7 = vld [vmem:[%s4388_s1 + $0x8] sm:$0xff]  ;;  %s4030_s8 = smov 112   ;;  %s4031_s7 = smov 120   ;;  %vm1901_vm3 = vcmask 130048  }
  0x7b   : > { %1287 = vmatpush.msra.mxu0 %v1263_v3  ;;  %v1298_v8 = vld [vmem:[%s4393_s18] sm:$0xff]  ;;  %s4947_s18 = sld [smem:[#allocation41_spill]]  ;;  %v1332_v14 = vld [vmem:[%s4398_s5 + $0x18] sm:$0xff]  ;;  %s4032_s2 = smov 104   ;;  %v1331_v25 = vld [vmem:[%s4398_s5 + $0x10] sm:$0xff]  ;;  %vm1904_vm4 = vcmask 195584  }
  0x7c   : > { %1319 = vmatpush.msra.mxu1 %v1300_v4  ;;  %v1260_v9 = vld [vmem:[%s4388_s1] sm:$0xff]  ;;  %1349 = vmatpush.msra.mxu2 %v1332_v14  ;;  %v1330_v26 = vld [vmem:[%s4398_s5 + $0x8] sm:$0xff]  ;;  %s4951_s24 = sld [smem:[#allocation42_spill]]  ;;  %s4033_s15 = smov 8  }
  0x7d   : > { %1288 = vmatpush.msra.mxu0 %v1262_v5  ;;  %v1329_v27 = vld [vmem:[%s4398_s5] sm:$0xff]  ;;  %s4034_s16 = smov 16   ;;  %s4035_s29 = smov 24  }
  0x7e   : > { %v4459_v10 = vld [vmem:[#allocation2] sm:$0xff]  ;;  %1320 = vmatpush.msra.mxu1 %v1299_v6  ;;  %1350 = vmatpush.msra.mxu2 %v1331_v25  ;;  %s4953_s1 = scalar_lea.vmem %s4859_s9, %s4378_s23  ;;  %s4960_s19 = sld [smem:[#allocation34_spill]] }
  0x7f   : > { %1289 = vmatpush.msra.mxu0 %v1261_v7  ;;  %v4465_v11 = vld [vmem:[#allocation2 + $0x8] sm:$0xff]  ;;  %s4950_s3 = scalar_lea.vmem %s4949_s10, %s4378_s23 }
  0x80   : > { %1321 = vmatpush.msra.mxu1 %v1298_v8  ;;  %v3600_v13 = vld [vmem:[%s4950_s3] ss:$0 sm:$0xff]  ;;  %1351 = vmatpush.msra.mxu2 %v1330_v26 }
  0x81   : > { %1290 = vmatpush.msra.mxu0 %v1260_v9  ;;  %3359 = vmatmul.msk.f32.vlgmr.msra.gmra.mxu1 %vm1268_vm1, %v4459_v10  ;;  %s4948_s4 = scalar_lea.vmem %s4947_s18, %s4378_s23  ;;  %s4038_s18 = smov 128  }
  0x82   : > { %3357 = vmatmul.msk.f32.vlgmr.msra.gmra.mxu0 %vm1268_vm1, %v4459_v10  ;;  %v3599_v12 = vld [vmem:[%s4948_s4] ss:$0 sm:$0xff]  ;;  %1352 = vmatpush.msra.mxu2 %v1329_v27  ;;  %s4952_s11 = scalar_lea.vmem %s4951_s24, %s4378_s23 }
  0x83   : > { %3361 = vmatmul.msk.f32.vlgmr.msra.gmra.mxu2 %vm1268_vm1, %v4459_v10  ;;  %v3601_v44 = vld [vmem:[%s4952_s11] ss:$0 sm:$0xff] }
  0x89   : > { %3360 = vmatmul.msk.f32.gmra.mxu1 %vm1268_vm1, %v4465_v11 }
  0x8a   : > { %3358 = vmatmul.msk.f32.gmra.mxu0 %vm1268_vm1, %v4465_v11 }
  0x8b   : > { %3362 = vmatmul.msk.f32.gmra.mxu2 %vm1268_vm1, %v4465_v11 }
  0xfe   : > { %v1323_v15 = vpop.f32.mrf.mxu1 }
  0xff   : > { %v1292_v16 = vpop.f32.mrf.mxu0  ;;  %v1324_v17 = vadd.f32 %v3599_v12, %v1323_v15 }
 0x100   : > { %v1293_v18 = vadd.f32 %v3600_v13, %v1292_v16 }
 0x101   : > { %1617 = vrot.lane.b32.xlu1 %v1324_v17, %s4030_s8  ;;  %1485 = vrot.lane.b32.xlu0 %v1324_v17, %s4031_s7 }
 0x102   : > { %v1360_v19 = vmul.f32 0.35355338, %v1293_v18  ;;  %3363 = vmatpush.xpose.msk.msrb.mxu0 %vm1362_vm2, %v1324_v17 }
 0x104   : > { %1615 = vrot.lane.b32.xlu2 %v1360_v19, %s4030_s8 }
 0x105   : > { %3364 = vmatmul.msk.f32.vlgmr.msrb.gmra.mxu0 %vm1362_vm2, %v1360_v19 }
 0x106   : > { %v1326_v20 = vpop.f32.mrf.mxu1  ;;  %v1354_v45 = vpop.f32.mrf.mxu2 }
 0x107   : > { %v1295_v21 = vpop.f32.mrf.mxu0  ;;  %v1327_v22 = vadd.f32 %v3599_v12, %v1326_v20  ;;  %v4524_v46 = vadd.f32 %v3601_v44, %v1354_v45 }
 0x108   : > { %v1296_v23 = vadd.f32 %v3600_v13, %v1295_v21 }
 0x109   : > { %3365 = vmatpush.xpose.msk.msra.mxu3 %vm1362_vm2, %v1327_v22  ;;  %1513 = vrot.lane.b32.xlu1 %v1327_v22, %s4031_s7 }
 0x10a   : > { %v1361_v24 = vmul.f32 0.35355338, %v1296_v23  ;;  %1483 = vrot.lane.b32.xlu0 %v1360_v19, %s4031_s7 }
 0x10c   : > { %1511 = vrot.lane.b32.xlu2 %v1361_v24, %s4031_s7  ;;  %3366 = vmatmul.msk.f32.vlgmr.msra.gmra.mxu3 %vm1362_vm2, %v1361_v24 }
 0x10d   : > { %1455 = vmatpush.msrb.mxu3 %v4524_v46 }
 0x10e   : > { %v1357_v47 = vpop.f32.mrf.mxu2 }
 0x10f   : > { %v4527_v48 = vadd.f32 %v3601_v44, %v1357_v47 }
 0x111   : > { %1747 = vrot.lane.b32.xlu1 %v1324_v17, %s4032_s2  ;;  %1478 = vmatpush.msra.mxu0 %v4527_v48 }
 0x112   : > { %1645 = vrot.lane.b32.xlu0 %v1327_v22, %s4030_s8 }
 0x114   : > { %1643 = vrot.lane.b32.xlu2 %v1361_v24, %s4030_s8 }
 0x119   : > { %1775 = vrot.lane.b32.xlu1 %v1327_v22, %s4032_s2 }
 0x11a   : > { %1745 = vrot.lane.b32.xlu0 %v1360_v19, %s4032_s2 }
 0x11c   : > { %1773 = vrot.lane.b32.xlu2 %v1361_v24, %s4032_s2 }
 0x15e   : > { %v1616_v28 = vpop.permute.xlu2 %1615 }
 0x166   : > { %v1512_v32 = vpop.permute.xlu2 %1511 }
 0x16e   : > { %v1644_v38 = vpop.permute.xlu2 %1643 }
 0x173   : > { %v1618_v29 = vpop.permute.xlu1 %1617  ;;  %v1486_v30 = vpop.permute.xlu0 %1485 }
 0x174   : > { %3369 = vmatpush.xpose.msk.msrb.mxu1 %vm1362_vm2, %v1486_v30 }
 0x176   : > { %v1774_v42 = vpop.permute.xlu2 %1773 }
 0x178   : > { %3375 = vmatpush.xpose.msk.msra.mxu1 %vm1362_vm2, %v1618_v29 }
 0x17b   : > { %v1514_v31 = vpop.permute.xlu1 %1513 }
 0x17c   : > { %v1484_v33 = vpop.permute.xlu0 %1483  ;;  %3371 = vmatpush.xpose.msk.msrb.mxu2 %vm1362_vm2, %v1514_v31 }
 0x17d   : > { %3370 = vmatmul.msk.f32.vlgmr.msrb.gmra.mxu1 %vm1362_vm2, %v1484_v33 }
 0x17f   : > { %3372 = vmatmul.msk.f32.vlgmr.msrb.gmra.mxu2 %vm1362_vm2, %v1512_v32 }
 0x182   : > { %v1386_v34 = vpop.f32.mrf.mxu0 }
 0x183   : > { %v1748_v35 = vpop.permute.xlu1 %1747  ;;  %v1415_v36 = vsel %vm1362_vm2, %v1386_v34, -inf }
 0x184   : > { %v1646_v37 = vpop.permute.xlu0 %1645  ;;  %1416 = vmax.xlane.f32.xlu0 %v1415_v36  ;;  %3381 = vmatpush.xpose.msk.msrb.mxu1 %vm1362_vm2, %v1748_v35 }
 0x185   : > { %3376 = vmatmul.msk.f32.vlgmr.msra.gmra.mxu1 %vm1362_vm2, %v1616_v28  ;;  %3377 = vmatpush.xpose.msk.msra.mxu2 %vm1362_vm2, %v1646_v37 }
 0x188   : > { %3378 = vmatmul.msk.f32.vlgmr.msra.gmra.mxu2 %vm1362_vm2, %v1644_v38 }
 0x18b   : > { %v1776_v39 = vpop.permute.xlu1 %1775 }
 0x18c   : > { %v1746_v40 = vpop.permute.xlu0 %1745  ;;  %3383 = vmatpush.xpose.msk.msrb.mxu2 %vm1362_vm2, %v1776_v39  ;;  %v3564_v39 = vpack.i.bf16 %v4527_v48, %v4524_v46 }
 0x18d   : > { %3382 = vmatmul.msk.f32.vlgmr.msrb.gmra.mxu1 %vm1362_vm2, %v1746_v40 }
 0x18f   : > { %v1412_v41 = vpop.f32.mrf.mxu3 }
 0x190   : > { %v1418_v43 = vsel %vm1362_vm2, %v1412_v41, -inf  ;;  %3384 = vmatmul.msk.f32.vlgmr.msrb.gmra.mxu2 %vm1362_vm2, %v1774_v42 }
 0x191   : > { %1419 = vmax.xlane.f32.xlu2 %v1418_v43 }
 0x1f7   : > { %v1417_v49 = vpop.xlane.xlu0 %1416 }
 0x1f8   : > { %v1421_v50 = vsub.f32 %v1386_v34, %v1417_v49 }
 0x1fa   : > { %v1423_v51 = vmul.f32 1.442695, %v1421_v50  ;;  %v1508_v52 = vpop.f32.mrf.mxu1 }
 0x1fb   : > { %v1539_v53 = vsel %vm1362_vm2, %v1508_v52, -inf }
 0x1fc   : > { %3609 = vpow2.f32 %v1423_v51  ;;  %1540 = vmax.xlane.f32.xlu1 %v1539_v53 }
 0x202   : > { %v3610_v54 = vpop.eup %3609  ;;  %v1640_v55 = vpop.f32.mrf.mxu1 }
 0x203   : > { %v1536_v56 = vpop.f32.mrf.mxu2  ;;  %v1671_v57 = vsel %vm1362_vm2, %v1640_v55, -inf  ;;  %v1427_v58 = vsel %vm1362_vm2, %v3610_v54, 0.0 }
 0x204   : > { %v1542_v59 = vsel %vm1362_vm2, %v1536_v56, -inf  ;;  %1672 = vmax.xlane.f32.xlu2 %v1671_v57  ;;  %1428 = vadd.xlane.f32.xlu1 %v1427_v58  ;;  %v1420_v60 = vpop.xlane.xlu2 %1419 }
 0x205   : > { %v1422_v61 = vsub.f32 %v1412_v41, %v1420_v60  ;;  %1543 = vmax.xlane.f32.xlu0 %v1542_v59 }
 0x207   : > { %v1425_v62 = vmul.f32 1.442695, %v1422_v61 }
 0x209   : > { %3611 = vpow2.f32 %v1425_v62 }
 0x20a   : > { %v1770_v63 = vpop.f32.mrf.mxu1 }
 0x20b   : > { %v1668_v0 = vpop.f32.mrf.mxu2  ;;  %v1801_v1 = vsel %vm1362_vm2, %v1770_v63, -inf }
 0x20c   : > { %1802 = vmax.xlane.f32.xlu1 %v1801_v1  ;;  %v1674_v2 = vsel %vm1362_vm2, %v1668_v0, -inf }
 0x20d   : > { %1675 = vmax.xlane.f32.xlu2 %v1674_v2 }
 0x20f   : > { %v3612_v3 = vpop.eup %3611 }
 0x210   : > { %v1430_v4 = vsel %vm1362_vm2, %v3612_v3, 0.0 }
 0x211   : > { %1431 = vadd.xlane.f32.xlu0 %v1430_v4 }
 0x213   : > { %v1798_v5 = vpop.f32.mrf.mxu2 }
 0x214   : > { %v1804_v6 = vsel %vm1362_vm2, %v1798_v5, -inf }
 0x219   : > { %1805 = vmax.xlane.f32.xlu0 %v1804_v6 }
 0x22d   : > { %1693 = vrot.lane.b32.xlu0 %v4524_v46, %s4030_s8 }
 0x26f   : > { %v1541_v7 = vpop.xlane.xlu1 %1540 }
 0x270   : > { %v1545_v8 = vsub.f32 %v1508_v52, %v1541_v7 }
 0x272   : > { %v1547_v9 = vmul.f32 1.442695, %v1545_v8 }
 0x274   : > { %3613 = vpow2.f32 %v1547_v9 }
 0x277   : > { %v1673_v12 = vpop.xlane.xlu2 %1672  ;;  %v1429_v13 = vpop.xlane.xlu1 %1428 }
 0x278   : > { %v1677_v14 = vsub.f32 %v1640_v55, %v1673_v12  ;;  %3615 = vrcp.f32 %v1429_v13  ;;  %v1544_v15 = vpop.xlane.xlu0 %1543 }
 0x279   : > { %v1546_v16 = vsub.f32 %v1536_v56, %v1544_v15 }
 0x27a   : > { %v3614_v17 = vpop.eup %3613  ;;  %v1679_v18 = vmul.f32 1.442695, %v1677_v14 }
 0x27b   : > { %v1549_v19 = vmul.f32 1.442695, %v1546_v16  ;;  %v1551_v20 = vsel %vm1362_vm2, %v3614_v17, 0.0 }
 0x27c   : > { %3617 = vpow2.f32 %v1679_v18  ;;  %1552 = vadd.xlane.f32.xlu2 %v1551_v20  ;;  %v1909_v18 = vld [vmem:[%s4346_s28 + $0x10] sm:$0xff]  ;;  %v1907_v20 = vld [vmem:[%s4346_s28] sm:$0xff] }
 0x27d   : > { %3619 = vpow2.f32 %v1549_v19  ;;  %v1908_v19 = vld [vmem:[%s4346_s28 + $0x8] sm:$0xff] }
 0x27e   : > { %v3616_v21 = vpop.eup %3615 }
 0x27f   : > { %v1803_v22 = vpop.xlane.xlu1 %1802  ;;  %v1435_v23 = vmul.f32 %v3616_v21, %v3610_v54 }
 0x280   : > { %v1807_v24 = vsub.f32 %v1770_v63, %v1803_v22  ;;  %v1676_v25 = vpop.xlane.xlu2 %1675 }
 0x281   : > { %3367 = vmatmul.msk.f32.vlgmr.msrb.gmra.mxu3 %vm1362_vm2, %v1435_v23  ;;  %v1678_v28 = vsub.f32 %v1668_v0, %v1676_v25 }
 0x282   : > { %v3618_v26 = vpop.eup %3617  ;;  %v1809_v27 = vmul.f32 1.442695, %v1807_v24 }
 0x283   : > { %v3620_v29 = vpop.eup %3619  ;;  %v1683_v30 = vsel %vm1362_vm2, %v3618_v26, 0.0  ;;  %v1681_v33 = vmul.f32 1.442695, %v1678_v28 }
 0x284   : > { %3621 = vpow2.f32 %v1809_v27  ;;  %1684 = vadd.xlane.f32.xlu1 %v1683_v30  ;;  %v1554_v31 = vsel %vm1362_vm2, %v3620_v29, 0.0  ;;  %v1432_v32 = vpop.xlane.xlu0 %1431 }
 0x285   : > { %1555 = vadd.xlane.f32.xlu0 %v1554_v31  ;;  %3623 = vrcp.f32 %v1432_v32 }
 0x286   : > { %3625 = vpow2.f32 %v1681_v33  ;;  %v3602_v33 = vld [vmem:[%s4953_s1] ss:$0 sm:$0xff]  ;;  %s4965_s1 = sld [smem:[#allocation55_spill]] }
 0x28a   : > { %v3622_v34 = vpop.eup %3621 }
 0x28b   : > { %v1813_v35 = vsel %vm1362_vm2, %v3622_v34, 0.0  ;;  %v3624_v36 = vpop.eup %3623 }
 0x28c   : > { %1814 = vadd.xlane.f32.xlu1 %v1813_v35  ;;  %v1436_v37 = vmul.f32 %v3624_v36, %v3612_v3  ;;  %v3626_v38 = vpop.eup %3625  ;;  %v1806_v41 = vpop.xlane.xlu0 %1805 }
 0x28d   : > { %v1686_v40 = vsel %vm1362_vm2, %v3626_v38, 0.0  ;;  %v1808_v42 = vsub.f32 %v1798_v5, %v1806_v41 }
 0x28e   : > { %3368 = vmatmul.msk.f32.vlgmr.msra.gmra.mxu0 %vm1362_vm2, %v1436_v37 }
 0x28f   : > { %v1811_v43 = vmul.f32 1.442695, %v1808_v42  ;;  %v4036_v42 = vmov 32.0  }
 0x291   : > { %3627 = vpow2.f32 %v1811_v43 }
 0x294   : > { %3565 = vrot.lane.b32.xlu2 %v3564_v39, %s4031_s7  ;;  %1687 = vadd.xlane.f32.xlu1 %v1686_v40 }
 0x297   : > { %v3628_v44 = vpop.eup %3627 }
 0x298   : > { %v1816_v45 = vsel %vm1362_vm2, %v3628_v44, 0.0 }
 0x299   : > { %1719 = vrot.lane.b32.xlu0 %v4527_v48, %s4030_s8 }
 0x29f   : > { %v1694_v49 = vpop.permute.xlu0 %1693 }
 0x2a1   : > { %1849 = vrot.lane.b32.xlu0 %v4527_v48, %s4032_s2 }
 0x2ad   : > { %1823 = vrot.lane.b32.xlu1 %v4524_v46, %s4032_s2 }
 0x2bd   : > { %1817 = vadd.xlane.f32.xlu2 %v1816_v45 }
 0x2ef   : > { %v1553_v47 = vpop.xlane.xlu2 %1552 }
 0x2f0   : > { %3629 = vrcp.f32 %v1553_v47 }
 0x2f6   : > { %v3630_v50 = vpop.eup %3629 }
 0x2f7   : > { %v3566_v51 = vpop.permute.xlu2 %3565  ;;  %v1685_v52 = vpop.xlane.xlu1 %1684  ;;  %v1559_v55 = vmul.f32 %v3630_v50, %v3614_v17  ;;  %v1910_v17 = vld [vmem:[%s4346_s28 + $0x18] sm:$0xff]  ;;  %v2042_v50 = vld [vmem:[%s4354_s22 + $0x10] sm:$0xff] }
 0x2f8   : > { %v3568_v53 = vunpack.i.h.bf16 %v3566_v51  ;;  %v3567_v54 = vunpack.i.l.bf16 %v3566_v51  ;;  %3631 = vrcp.f32 %v1685_v52  ;;  %v1556_v48 = vpop.xlane.xlu0 %1555  ;;  %1933 = vmatpush.msra.mxu1 %v1910_v17  ;;  %v2041_v51 = vld [vmem:[%s4354_s22 + $0x8] sm:$0xff] }
 0x2f9   : > { %3633 = vrcp.f32 %v1556_v48 }
 0x2fa   : > { %1583 = vmatpush.msra.mxu3 %v3567_v54  ;;  %1610 = vmatpush.msrb.mxu0 %v3568_v53  ;;  %v1255_v54 = vld [vmem:[#allocation3] sm:$0xff] }
 0x2fb   : > { %3373 = vmatmul.msk.f32.vlgmr.msra.gmra.mxu3 %vm1362_vm2, %v1559_v55  ;;  %1934 = vmatpush.msra.mxu1 %v1909_v18  ;;  %v4630_v18 = vld [vmem:[%s4433_s17] sm:$0x3f] }
 0x2fc   : > { %1714 = vmatpush.msrb.mxu3 %v1694_v49  ;;  %v2043_v49 = vld [vmem:[%s4354_s22 + $0x18] sm:$0xff] }
 0x2fd   : > { %1935 = vmatpush.msra.mxu1 %v1908_v19 }
 0x2fe   : > { %v3632_v46 = vpop.eup %3631 }
 0x2ff   : > { %v3634_v56 = vpop.eup %3633  ;;  %v1815_v57 = vpop.xlane.xlu1 %1814  ;;  %v1691_v59 = vmul.f32 %v3632_v46, %v3618_v26  ;;  %1936 = vmatpush.msra.mxu1 %v1907_v20 }
 0x300   : > { %v1560_v58 = vmul.f32 %v3634_v56, %v3620_v29 }
 0x302   : > { %3374 = vmatmul.msk.f32.vlgmr.msrb.gmra.mxu0 %vm1362_vm2, %v1560_v58  ;;  %v4603_v58 = vld [vmem:[#allocation3 + $0x10] sm:$0xff] }
 0x303   : > { %3379 = vmatmul.msk.f32.vlgmr.msrb.gmra.mxu3 %vm1362_vm2, %v1691_v59 }
 0x304   : > { %v1457_v7 = vpop.f32.mrf.mxu3 }
 0x307   : > { %v1688_v60 = vpop.xlane.xlu1 %1687 }
 0x308   : > { %3635 = vrcp.f32 %v1688_v60 }
 0x309   : > { %3637 = vrcp.f32 %v1815_v57  ;;  %v4599_v57 = vld [vmem:[#allocation3 + $0x8] sm:$0xff] }
 0x30b   : > { %v1720_v61 = vpop.permute.xlu0 %1719  ;;  %v1480_v9 = vpop.f32.mrf.mxu0 }
 0x30c   : > { %1740 = vmatpush.msra.mxu0 %v1720_v61 }
 0x30e   : > { %v3636_v62 = vpop.eup %3635 }
 0x30f   : > { %v1692_v63 = vmul.f32 %v3636_v62, %v3626_v38  ;;  %v3638_v1 = vpop.eup %3637 }
 0x310   : > { %v1821_v2 = vmul.f32 %v3638_v1, %v3622_v34  ;;  %v2006_v1 = vld [vmem:[%s4352_s0 + $0x18] sm:$0xff] }
 0x311   : > { %3380 = vmatmul.msk.f32.vlgmr.msra.gmra.mxu0 %vm1362_vm2, %v1692_v63  ;;  %v4612_v63 = vld [vmem:[#allocation3 + $0x18] sm:$0xff]  ;;  %2029 = vmatpush.msra.mxu2 %v2006_v1 }
 0x313   : > { %v1850_v0 = vpop.permute.xlu0 %1849 }
 0x314   : > { %1870 = vmatpush.msrb.mxu0 %v1850_v0 }
 0x31f   : > { %v1824_v3 = vpop.permute.xlu1 %1823 }
 0x320   : > { %1844 = vmatpush.msra.mxu3 %v1824_v3  ;;  %v2004_v3 = vld [vmem:[%s4352_s0 + $0x8] sm:$0xff] }
 0x321   : > { %3385 = vmatmul.msk.f32.vlgmr.msra.gmra.mxu3 %vm1362_vm2, %v1821_v2  ;;  %v2005_v2 = vld [vmem:[%s4352_s0 + $0x10] sm:$0xff] }
 0x322   : > { %2072 = vmatpush.msrb.mxu3 %v2043_v49  ;;  %2030 = vmatpush.msra.mxu2 %v2005_v2 }
 0x324   : > { %2073 = vmatpush.msrb.mxu3 %v2042_v50  ;;  %2031 = vmatpush.msra.mxu2 %v2004_v3  ;;  %v3604_v50 = vld [vmem:[%s4956_s20] ss:$0 sm:$0xff] }
 0x326   : > { %2074 = vmatpush.msrb.mxu3 %v2041_v51 }
 0x330   : > { %v1818_v4 = vpop.xlane.xlu2 %1817 }
 0x331   : > { %3639 = vrcp.f32 %v1818_v4  ;;  %v2003_v4 = vld [vmem:[%s4352_s0] sm:$0xff]  ;;  %s4955_s0 = scalar_lea.vmem %s4864_s14, %s4378_s23  ;;  %s4964_s23 = sld [smem:[#allocation30_spill]] }
 0x332   : > { %3641 = vrcp.f32 %v4036_v42  ;;  %2032 = vmatpush.msra.mxu2 %v2003_v4  ;;  %v3603_v17 = vld [vmem:[%s4955_s0] ss:$0 sm:$0xff] }
 0x337   : > { %v3640_v5 = vpop.eup %3639  ;;  %p3502_p3 = scmp.eq.s32.totalorder %s4964_s23, 1 }
 0x338   : > { %v1822_v6 = vmul.f32 %v3640_v5, %v3628_v44  ;;  %v3642_v43 = vpop.eup %3641 }
 0x339   : > { %v1953_v44 = vmul.f32 32.0, %v3642_v43  ;;  %vm1957_vm5 = vweird.f32 %v3642_v43 }
 0x33a   : > { %3386 = vmatmul.msk.f32.vlgmr.msrb.gmra.mxu0 %vm1362_vm2, %v1822_v6 }
 0x33b   : > { %v1954_v45 = vsub.f32 1.0, %v1953_v44 }
 0x37e   : > { %v1585_v8 = vpop.f32.mrf.mxu3 }
 0x37f   : > { %1877 = vrot.lane.b32.xlu1 %v1585_v8, %s4033_s15  ;;  %v1612_v13 = vpop.f32.mrf.mxu0 }
 0x386   : > { %v1716_v12 = vpop.f32.mrf.mxu3 }
 0x387   : > { %1885 = vrot.lane.b32.xlu0 %v1716_v12, %s4034_s16 }
 0x38e   : > { %v1742_v15 = vpop.f32.mrf.mxu0 }
 0x38f   : > { %1879 = vrot.lane.b32.xlu0 %v1612_v13, %s4033_s15 }
 0x3a4   : > { %v1846_v14 = vpop.f32.mrf.mxu3 }
 0x3a5   : > { %1893 = vrot.lane.b32.xlu1 %v1846_v14, %s4035_s29 }
 0x3ad   : > { %1887 = vrot.lane.b32.xlu1 %v1742_v15, %s4034_s16 }
 0x3b7   : > { %v1872_v16 = vpop.f32.mrf.mxu0 }
 0x3b8   : > { %1895 = vrot.lane.b32.xlu0 %v1872_v16, %s4035_s29 }
 0x3f1   : > { %v1878_v21 = vpop.permute.xlu1 %1877 }
 0x3f2   : > { %v1899_v23 = vsel %vm1362_vm2, %v1457_v7, %v1878_v21 }
 0x3f9   : > { %v1886_v22 = vpop.permute.xlu0 %1885 }
 0x3fa   : > { %v1902_v24 = vsel %vm1901_vm3, %v1899_v23, %v1886_v22 }
 0x401   : > { %v1880_v27 = vpop.permute.xlu0 %1879 }
 0x402   : > { %v1900_v29 = vsel %vm1362_vm2, %v1480_v9, %v1880_v27 }
 0x417   : > { %v1894_v25 = vpop.permute.xlu1 %1893 }
 0x418   : > { %v1905_v26 = vsel %vm1904_vm4, %v1902_v24, %v1894_v25 }
 0x419   : > { %3387 = vmatmul.msk.f32.vlgmr.msra.gmra.mxu1 %vm1268_vm1, %v1905_v26  ;;  %v1997_v26 = vperm.slane %v4630_v18, 0 }
 0x41f   : > { %v1888_v28 = vpop.permute.xlu1 %1887 }
 0x420   : > { %v1903_v30 = vsel %vm1901_vm3, %v1900_v29, %v1888_v28 }
 0x42a   : > { %v1896_v31 = vpop.permute.xlu0 %1895 }
 0x42b   : > { %v1906_v32 = vsel %vm1904_vm4, %v1903_v30, %v1896_v31  ;;  %v2000_v30 = vperm.slane %v4630_v18, 1 }
 0x42c   : > { %3388 = vmatmul.msk.f32.gmra.mxu1 %vm1268_vm1, %v1906_v32 }
 0x496   : > { %v1938_v34 = vpop.f32.mrf.mxu1 }
 0x497   : > { %v1939_v35 = vadd.f32 %v3602_v33, %v1938_v34 }
 0x499   : > { %v1944_v36 = vadd.f32 %v1939_v35, %v4459_v10  ;;  %v1955_v10 = vmul.f32 %v3642_v43, %v1954_v45 }
 0x49b   : > { %v1946_v37 = vsel %vm1268_vm1, %v1944_v36, 0.0  ;;  %v1956_v47 = vadd.f32 %v3642_v43, %v1955_v10 }
 0x49c   : > { %1947 = vadd.xlane.f32.xlu2 %v1946_v37 }
 0x49d   : > { %v4593_v52 = vsel %vm1957_vm5, %v3642_v43, %v1956_v47 }
 0x4a9   : > { %v1941_v38 = vpop.f32.mrf.mxu1 }
 0x4aa   : > { %v1942_v39 = vadd.f32 %v3602_v33, %v1941_v38 }
 0x4ac   : > { %v1945_v40 = vadd.f32 %v1942_v39, %v4465_v11  ;;  %v2040_v11 = vld [vmem:[%s4354_s22] sm:$0xff]  ;;  %s4954_s22 = sld [smem:[#allocation32_spill]] }
 0x4ad   : > { %2075 = vmatpush.msrb.mxu3 %v2040_v11 }
 0x4ae   : > { %v1949_v41 = vsel %vm1268_vm1, %v1945_v40, 0.0  ;;  %3391 = vmatmul.msk.f32.vlgmr.msrb.gmra.mxu3 %vm1268_vm1, %v1255_v54 }
 0x4af   : > { %1950 = vadd.xlane.f32.xlu1 %v1949_v41 }
 0x4b2   : > { %v2092_v14 = vld [vmem:[%s4954_s22 + $0x18] sm:$0xff]  ;;  %v2091_v15 = vld [vmem:[%s4954_s22 + $0x10] sm:$0xff]  ;;  %v2090_v20 = vld [vmem:[%s4954_s22 + $0x8] sm:$0xff] }
 0x4b3   : > { %2109 = vmatpush.msra.mxu0 %v2092_v14  ;;  %v2089_v25 = vld [vmem:[%s4954_s22] sm:$0xff]  ;;  %s2956_s22 = sshll.u32 %s4965_s1, 4  ;;  %s2957_s22 = int_to_ptr.hbm [resolvable:$true] %s2956_s22 }
 0x4b5   : > { %2110 = vmatpush.msra.mxu0 %v2091_v15 }
 0x4b6   : > { %3392 = vmatmul.msk.f32.gmra.mxu3 %vm1268_vm1, %v4599_v57 }
 0x4b7   : > { %2111 = vmatpush.msra.mxu0 %v2090_v20 }
 0x4b9   : > { %2112 = vmatpush.msra.mxu0 %v2089_v25 }
 0x4ba   : > { %3395 = vmatmul.msk.f32.vlgmr.msra.gmra.mxu0 %vm1268_vm1, %v1255_v54 }
 0x4be   : > { %3393 = vmatmul.msk.f32.gmra.mxu3 %vm1268_vm1, %v4603_v58 }
 0x4c2   : > { %3396 = vmatmul.msk.f32.gmra.mxu0 %vm1268_vm1, %v4599_v57 }
 0x4c6   : > { %3394 = vmatmul.msk.f32.gmra.mxu3 %vm1268_vm1, %v4612_v63 }
 0x4ca   : > { %3397 = vmatmul.msk.f32.gmra.mxu0 %vm1268_vm1, %v4603_v58 }
 0x4d2   : > { %3398 = vmatmul.msk.f32.gmra.mxu0 %vm1268_vm1, %v4612_v63 }
 0x50f   : > { %v1948_v53 = vpop.xlane.xlu2 %1947 }
 0x510   : > { %v1959_v48 = vmul.f32 %v4593_v52, %v1948_v53 }
 0x512   : > { %v1961_v55 = vsub.f32 %v1944_v36, %v1959_v48  ;;  %v3605_v48 = vld [vmem:[%s1227_s30] ss:$0 sm:$0xff]  ;;  %s4958_s30 = sld [smem:[#allocation33_spill]] }
 0x514   : > { %v1963_v46 = vmul.f32 %v1961_v55, %v1961_v55 }
 0x516   : > { %v1965_v56 = vsel %vm1268_vm1, %v1963_v46, 0.0 }
 0x517   : > { %1966 = vadd.xlane.f32.xlu0 %v1965_v56 }
 0x522   : > { %v1951_v59 = vpop.xlane.xlu1 %1950 }
 0x523   : > { %v1960_v60 = vmul.f32 %v4593_v52, %v1951_v59 }
 0x525   : > { %v4608_v61 = vsub.f32 %v1945_v40, %v1960_v60 }
 0x527   : > { %v1964_v62 = vmul.f32 %v4608_v61, %v4608_v61 }
 0x529   : > { %v1968_v0 = vsel %vm1268_vm1, %v1964_v62, 0.0 }
 0x52a   : > { %1969 = vadd.xlane.f32.xlu2 %v1968_v0 }
 0x531   : > { %v2077_v16 = vpop.f32.mrf.mxu3 }
 0x532   : > { %v2078_v22 = vadd.f32 %v3603_v17, %v2077_v16 }
 0x534   : > { %2256 = vrot.lane.b32.xlu0 %v2078_v22, %s4031_s7 }
 0x537   : > { %v2114_v54 = vpop.f32.mrf.mxu0 }
 0x538   : > { %v4681_v46 = vadd.f32 %v3605_v48, %v2114_v54 }
 0x539   : > { %v2080_v31 = vpop.f32.mrf.mxu3 }
 0x53a   : > { %v2081_v33 = vadd.f32 %v3603_v17, %v2080_v31 }
 0x53c   : > { %2258 = vrot.lane.b32.xlu1 %v2081_v33, %s4031_s7  ;;  %3399 = vmatpush.xpose.msk.msrb.mxu1 %vm1362_vm2, %v2081_v33 }
 0x540   : > { %3400 = vmatpush.xpose.msk.msrb.mxu1 %vm1362_vm2, %v2078_v22 }
 0x541   : > { %v2083_v37 = vpop.f32.mrf.mxu3 }
 0x542   : > { %v2084_v39 = vadd.f32 %v3603_v17, %v2083_v37 }
 0x544   : > { %2288 = vrot.lane.b32.xlu2 %v2084_v39, %s4031_s7  ;;  %2406 = vrot.lane.b32.xlu1 %v2081_v33, %s4030_s8 }
 0x549   : > { %v2086_v43 = vpop.f32.mrf.mxu3 }
 0x54a   : > { %v2087_v45 = vadd.f32 %v3603_v17, %v2086_v43 }
 0x54c   : > { %2290 = vrot.lane.b32.xlu0 %v2087_v45, %s4031_s7  ;;  %2436 = vrot.lane.b32.xlu2 %v2084_v39, %s4030_s8 }
 0x54d   : > { %2550 = vrot.lane.b32.xlu1 %v2081_v33, %s4032_s2  ;;  %3402 = vmatpush.xpose.msk.msrb.mxu2 %vm1362_vm2, %v2087_v45 }
 0x551   : > { %3403 = vmatpush.xpose.msk.msrb.mxu2 %vm1362_vm2, %v2084_v39 }
 0x554   : > { %2404 = vrot.lane.b32.xlu0 %v2078_v22, %s4030_s8 }
 0x55c   : > { %2438 = vrot.lane.b32.xlu0 %v2087_v45, %s4030_s8 }
 0x564   : > { %2548 = vrot.lane.b32.xlu0 %v2078_v22, %s4032_s2 }
 0x56c   : > { %2582 = vrot.lane.b32.xlu0 %v2087_v45, %s4032_s2 }
 0x58a   : > { %v1967_v5 = vpop.xlane.xlu0 %1966 }
 0x58b   : > { %v1971_v6 = vmul.f32 %v1967_v5, %v4593_v52 }
 0x58d   : > { %v1973_v7 = vadd.f32 1e-05, %v1971_v6 }
 0x58f   : > { %3643 = vrsqrt.f32 %v1973_v7  ;;  %vm1981_vm7 = vweird.f32 %v1973_v7 }
 0x595   : > { %v3644_v8 = vpop.eup %3643 }
 0x596   : > { %v1976_v9 = vmul.f32 %v3644_v8, %v1973_v7  ;;  %vm1982_vm6 = vweird.f32 %v3644_v8 }
 0x597   : > { %vm1983_vm8 = vmor %vm1981_vm7, %vm1982_vm6 }
 0x598   : > { %v1977_v12 = vmul.f32 %v3644_v8, %v1976_v9 }
 0x59a   : > { %v1978_v13 = vmul.f32 0.5, %v1977_v12 }
 0x59c   : > { %v1979_v19 = vsub.f32 1.5, %v1978_v13 }
 0x59d   : > { %v1970_v21 = vpop.xlane.xlu2 %1969 }
 0x59e   : > { %v1980_v23 = vmul.f32 %v3644_v8, %v1979_v19  ;;  %v1972_v24 = vmul.f32 %v1970_v21, %v4593_v52 }
 0x5a0   : > { %v1984_v27 = vsel %vm1983_vm8, %v3644_v8, %v1980_v23  ;;  %v1974_v28 = vadd.f32 1e-05, %v1972_v24 }
 0x5a1   : > { %v1995_v29 = vmul.f32 %v1984_v27, %v1961_v55  ;;  %v2117_v55 = vpop.f32.mrf.mxu0 }
 0x5a2   : > { %3645 = vrsqrt.f32 %v1974_v28  ;;  %vm1991_vm10 = vweird.f32 %v1974_v28  ;;  %v4683_v56 = vadd.f32 %v3605_v48, %v2117_v55 }
 0x5a3   : > { %v1998_v32 = vmul.f32 %v1997_v26, %v1995_v29 }
 0x5a4   : > { %2225 = vmatpush.msra.mxu1 %v4683_v56 }
 0x5a5   : > { %v4639_v34 = vadd.f32 %v2000_v30, %v1998_v32  ;;  %v2289_v2 = vpop.permute.xlu2 %2288 }
 0x5a6   : > { %2226 = vmatpush.msra.mxu1 %v4681_v46 }
 0x5a7   : > { %3389 = vmatmul.msk.f32.vlgmr.msra.gmra.mxu2 %vm1268_vm1, %v4639_v34 }
 0x5a8   : > { %v3646_v35 = vpop.eup %3645 }
 0x5a9   : > { %v1986_v36 = vmul.f32 %v3646_v35, %v1974_v28  ;;  %vm1992_vm9 = vweird.f32 %v3646_v35  ;;  %v2120_v60 = vpop.f32.mrf.mxu0 }
 0x5aa   : > { %vm1993_vm11 = vmor %vm1991_vm10, %vm1992_vm9  ;;  %v4690_v63 = vadd.f32 %v3605_v48, %v2120_v60 }
 0x5ab   : > { %v1987_v38 = vmul.f32 %v3646_v35, %v1986_v36 }
 0x5ad   : > { %v1988_v40 = vmul.f32 0.5, %v1987_v38  ;;  %v2437_v8 = vpop.permute.xlu2 %2436 }
 0x5ae   : > { %v2259_v3 = vpop.permute.xlu1 %2258 }
 0x5af   : > { %v1989_v41 = vsub.f32 1.5, %v1988_v40 }
 0x5b1   : > { %v1990_v42 = vmul.f32 %v3646_v35, %v1989_v41  ;;  %v2123_v62 = vpop.f32.mrf.mxu0 }
 0x5b2   : > { %v4692_v0 = vadd.f32 %v3605_v48, %v2123_v62 }
 0x5b3   : > { %v1994_v44 = vsel %vm1993_vm11, %v3646_v35, %v1990_v42 }
 0x5b4   : > { %v1996_v10 = vmul.f32 %v1994_v44, %v4608_v61  ;;  %v2257_v61 = vpop.permute.xlu0 %2256  ;;  %2248 = vmatpush.msra.mxu2 %v4692_v0  ;;  %v3579_v54 = vpack.i.bf16 %v4690_v63, %v4692_v0 }
 0x5b6   : > { %v1999_v47 = vmul.f32 %v1997_v26, %v1996_v10  ;;  %2249 = vmatpush.msra.mxu2 %v4690_v63  ;;  %v2407_v28 = vpop.permute.xlu1 %2406 }
 0x5b8   : > { %v4657_v49 = vadd.f32 %v2000_v30, %v1999_v47 }
 0x5ba   : > { %3390 = vmatmul.msk.f32.gmra.mxu2 %vm1268_vm1, %v4657_v49 }
 0x5be   : > { %v2291_v1 = vpop.permute.xlu0 %2290 }
 0x5bf   : > { %v2551_v31 = vpop.permute.xlu1 %2550 }
 0x5c6   : > { %v2405_v26 = vpop.permute.xlu0 %2404 }
 0x5ce   : > { %v2439_v30 = vpop.permute.xlu0 %2438 }
 0x5d6   : > { %v2549_v32 = vpop.permute.xlu0 %2548 }
 0x62a   : > { %v2034_v51 = vpop.f32.mrf.mxu2 }
 0x62b   : > { %v2035_v11 = vadd.f32 %v3604_v50, %v2034_v51 }
 0x62d   : > { %v2126_v53 = vmul.f32 0.35355338, %v2035_v11 }
 0x62f   : > { %2254 = vrot.lane.b32.xlu2 %v2126_v53, %s4031_s7  ;;  %3401 = vmatmul.msk.f32.vlgmr.msrb.gmra.mxu1 %vm1362_vm2, %v2126_v53 }
 0x630   : > { %3407 = vmatpush.xpose.msk.msrb.mxu1 %vm1362_vm2, %v2259_v3 }
 0x634   : > { %3408 = vmatpush.xpose.msk.msrb.mxu1 %vm1362_vm2, %v2257_v61 }
 0x637   : > { %2402 = vrot.lane.b32.xlu2 %v2126_v53, %s4030_s8 }
 0x63d   : > { %v2037_v57 = vpop.f32.mrf.mxu2 }
 0x63e   : > { %v2038_v58 = vadd.f32 %v3604_v50, %v2037_v57  ;;  %v3574_v57 = vpack.i.bf16 %v4681_v46, %v4683_v56 }
 0x640   : > { %v2127_v59 = vmul.f32 0.35355338, %v2038_v58 }
 0x642   : > { %2286 = vrot.lane.b32.xlu1 %v2127_v59, %s4031_s7  ;;  %3404 = vmatmul.msk.f32.vlgmr.msrb.gmra.mxu2 %vm1362_vm2, %v2127_v59 }
 0x643   : > { %3410 = vmatpush.xpose.msk.msrb.mxu2 %vm1362_vm2, %v2291_v1 }
 0x647   : > { %3411 = vmatpush.xpose.msk.msrb.mxu2 %vm1362_vm2, %v2289_v2 }
 0x64a   : > { %2434 = vrot.lane.b32.xlu1 %v2127_v59, %s4030_s8 }
 0x652   : > { %2580 = vrot.lane.b32.xlu1 %v2084_v39, %s4032_s2  ;;  %v2583_v39 = vpop.permute.xlu0 %2582 }
 0x689   : > { %v2255_v9 = vpop.permute.xlu2 %2254 }
 0x691   : > { %v2403_v12 = vpop.permute.xlu2 %2402 }
 0x6ac   : > { %v2154_v4 = vpop.f32.mrf.mxu1 }
 0x6ad   : > { %v2186_v5 = vsel %vm1901_vm3, %v2154_v4, -inf }
 0x6ae   : > { %2187 = vmax.xlane.f32.xlu2 %v2186_v5 }
 0x6b4   : > { %v2287_v35 = vpop.permute.xlu1 %2286 }
 0x6bc   : > { %v2435_v38 = vpop.permute.xlu1 %2434 }
 0x6c4   : > { %v2581_v40 = vpop.permute.xlu1 %2580 }
 0x6c5   : > { %v2183_v6 = vpop.f32.mrf.mxu2 }
 0x6c6   : > { %v2189_v7 = vsel %vm1901_vm3, %v2183_v6, -inf }
 0x6c7   : > { %2190 = vmax.xlane.f32.xlu2 %v2189_v7 }
 0x6df   : > { %2546 = vrot.lane.b32.xlu2 %v2126_v53, %s4032_s2 }
 0x721   : > { %v2188_v13 = vpop.xlane.xlu2 %2187 }
 0x722   : > { %v2192_v14 = vsub.f32 %v2154_v4, %v2188_v13 }
 0x724   : > { %v2194_v15 = vmul.f32 1.442695, %v2192_v14 }
 0x726   : > { %3647 = vpow2.f32 %v2194_v15 }
 0x72c   : > { %v3648_v16 = vpop.eup %3647 }
 0x72d   : > { %v2198_v17 = vsel %vm1901_vm3, %v3648_v16, 0.0 }
 0x72e   : > { %2199 = vadd.xlane.f32.xlu2 %v2198_v17 }
 0x73a   : > { %v2191_v19 = vpop.xlane.xlu2 %2190 }
 0x73b   : > { %v2193_v20 = vsub.f32 %v2183_v6, %v2191_v19 }
 0x73d   : > { %v2196_v21 = vmul.f32 1.442695, %v2193_v20 }
 0x73f   : > { %3649 = vpow2.f32 %v2196_v21 }
 0x742   : > { %v2547_v24 = vpop.permute.xlu2 %2546 }
 0x745   : > { %v3650_v22 = vpop.eup %3649 }
 0x746   : > { %v2201_v23 = vsel %vm1901_vm3, %v3650_v22, 0.0 }
 0x747   : > { %2202 = vadd.xlane.f32.xlu2 %v2201_v23 }
 0x75f   : > { %2578 = vrot.lane.b32.xlu2 %v2127_v59, %s4032_s2 }
 0x7a1   : > { %v2200_v25 = vpop.xlane.xlu2 %2199 }
 0x7a2   : > { %3651 = vrcp.f32 %v2200_v25 }
 0x7a8   : > { %v3652_v27 = vpop.eup %3651 }
 0x7a9   : > { %v2206_v29 = vmul.f32 %v3652_v27, %v3648_v16 }
 0x7ab   : > { %3405 = vmatmul.msk.f32.vlgmr.msra.gmra.mxu1 %vm1901_vm3, %v2206_v29 }
 0x7ac   : > { %3415 = vmatpush.xpose.msk.msra.mxu1 %vm1362_vm2, %v2407_v28 }
 0x7b0   : > { %3416 = vmatpush.xpose.msk.msra.mxu1 %vm1362_vm2, %v2405_v26 }
 0x7b3   : > { %3409 = vmatmul.msk.f32.vlgmr.msrb.gmra.mxu1 %vm1362_vm2, %v2255_v9 }
 0x7b4   : > { %3423 = vmatpush.xpose.msk.msrb.mxu1 %vm1362_vm2, %v2551_v31 }
 0x7b8   : > { %3424 = vmatpush.xpose.msk.msrb.mxu1 %vm1362_vm2, %v2549_v32 }
 0x7ba   : > { %v2203_v33 = vpop.xlane.xlu2 %2202 }
 0x7bb   : > { %3653 = vrcp.f32 %v2203_v33  ;;  %3417 = vmatmul.msk.f32.vlgmr.msra.gmra.mxu1 %vm1362_vm2, %v2403_v12 }
 0x7c1   : > { %v3654_v36 = vpop.eup %3653 }
 0x7c2   : > { %v2207_v37 = vmul.f32 %v3654_v36, %v3650_v22  ;;  %v2579_v41 = vpop.permute.xlu2 %2578 }
 0x7c3   : > { %3425 = vmatmul.msk.f32.vlgmr.msrb.gmra.mxu1 %vm1362_vm2, %v2547_v24 }
 0x7c4   : > { %3406 = vmatmul.msk.f32.vlgmr.msra.gmra.mxu2 %vm1901_vm3, %v2207_v37 }
 0x7c5   : > { %3418 = vmatpush.xpose.msk.msra.mxu2 %vm1362_vm2, %v2439_v30 }
 0x7c9   : > { %3419 = vmatpush.xpose.msk.msra.mxu2 %vm1362_vm2, %v2437_v8 }
 0x7cc   : > { %3412 = vmatmul.msk.f32.vlgmr.msrb.gmra.mxu2 %vm1362_vm2, %v2287_v35 }
 0x7cd   : > { %3426 = vmatpush.xpose.msk.msrb.mxu2 %vm1362_vm2, %v2583_v39 }
 0x7d1   : > { %3427 = vmatpush.xpose.msk.msrb.mxu2 %vm1362_vm2, %v2581_v40 }
 0x7d4   : > { %3420 = vmatmul.msk.f32.vlgmr.msra.gmra.mxu2 %vm1362_vm2, %v2435_v38 }
 0x7dc   : > { %3428 = vmatmul.msk.f32.vlgmr.msrb.gmra.mxu2 %vm1362_vm2, %v2579_v41 }
 0x828   : > { %v4723_v42 = vpop.f32.mrf.mxu1 }
 0x830   : > { %v2283_v43 = vpop.f32.mrf.mxu1 }
 0x831   : > { %v2318_v44 = vsel %vm1901_vm3, %v2283_v43, -inf }
 0x832   : > { %2319 = vmax.xlane.f32.xlu0 %v2318_v44 }
 0x838   : > { %v2431_v45 = vpop.f32.mrf.mxu1 }
 0x839   : > { %v2466_v10 = vsel %vm1901_vm3, %v2431_v45, -inf }
 0x83a   : > { %2467 = vmax.xlane.f32.xlu1 %v2466_v10 }
 0x840   : > { %v2575_v47 = vpop.f32.mrf.mxu1 }
 0x841   : > { %v2610_v50 = vsel %vm1901_vm3, %v2575_v47, -inf }
 0x842   : > { %2611 = vmax.xlane.f32.xlu0 %v2610_v50 }
 0x847   : > { %v4728_v51 = vpop.f32.mrf.mxu2 }
 0x84f   : > { %v2315_v11 = vpop.f32.mrf.mxu2 }
 0x850   : > { %v2321_v53 = vsel %vm1901_vm3, %v2315_v11, -inf }
 0x851   : > { %2322 = vmax.xlane.f32.xlu2 %v2321_v53 }
 0x856   : > { %3580 = vrot.lane.b32.xlu0 %v3579_v54, %s4031_s7 }
 0x857   : > { %v2463_v48 = vpop.f32.mrf.mxu2 }
 0x858   : > { %v2469_v55 = vsel %vm1901_vm3, %v2463_v48, -inf }
 0x859   : > { %2470 = vmax.xlane.f32.xlu1 %v2469_v55 }
 0x85f   : > { %v2607_v58 = vpop.f32.mrf.mxu2 }
 0x860   : > { %v2613_v59 = vsel %vm1901_vm3, %v2607_v58, -inf }
 0x869   : > { %3575 = vrot.lane.b32.xlu2 %v3574_v57, %s4030_s8 }
 0x872   : > { %3570 = vrot.lane.b32.xlu1 %v3574_v57, %s4031_s7 }
 0x892   : > { %2614 = vmax.xlane.f32.xlu2 %v2613_v59 }
 0x8a5   : > { %v2320_v60 = vpop.xlane.xlu0 %2319 }
 0x8a6   : > { %v2324_v61 = vsub.f32 %v2283_v43, %v2320_v60 }
 0x8a8   : > { %v2326_v62 = vmul.f32 1.442695, %v2324_v61 }
 0x8aa   : > { %3655 = vpow2.f32 %v2326_v62 }
 0x8ad   : > { %v2468_v63 = vpop.xlane.xlu1 %2467 }
 0x8ae   : > { %v2472_v0 = vsub.f32 %v2431_v45, %v2468_v63 }
 0x8b0   : > { %v3656_v1 = vpop.eup %3655  ;;  %v2474_v2 = vmul.f32 1.442695, %v2472_v0 }
 0x8b1   : > { %v2330_v3 = vsel %vm1901_vm3, %v3656_v1, 0.0 }
 0x8b2   : > { %3657 = vpow2.f32 %v2474_v2  ;;  %2331 = vadd.xlane.f32.xlu0 %v2330_v3 }
 0x8b5   : > { %v2612_v46 = vpop.xlane.xlu0 %2611 }
 0x8b6   : > { %v2616_v56 = vsub.f32 %v2575_v47, %v2612_v46 }
 0x8b8   : > { %v3658_v4 = vpop.eup %3657  ;;  %v2618_v5 = vmul.f32 1.442695, %v2616_v56 }
 0x8b9   : > { %v2478_v6 = vsel %vm1901_vm3, %v3658_v4, 0.0 }
 0x8ba   : > { %3659 = vpow2.f32 %v2618_v5  ;;  %2479 = vadd.xlane.f32.xlu2 %v2478_v6 }
 0x8c0   : > { %v3660_v7 = vpop.eup %3659 }
 0x8c1   : > { %v2622_v8 = vsel %vm1901_vm3, %v3660_v7, 0.0 }
 0x8c2   : > { %2623 = vadd.xlane.f32.xlu0 %v2622_v8  ;;  %v2723_v8 = vld [vmem:[%s4958_s30 + $0x18] sm:$0xff] }
 0x8c3   : > { %2746 = vmatpush.msra.mxu1 %v2723_v8 }
 0x8c4   : > { %v2323_v9 = vpop.xlane.xlu2 %2322 }
 0x8c5   : > { %v2325_v12 = vsub.f32 %v2315_v11, %v2323_v9  ;;  %v2722_v9 = vld [vmem:[%s4958_s30 + $0x10] sm:$0xff] }
 0x8c6   : > { %2747 = vmatpush.msra.mxu1 %v2722_v9 }
 0x8c7   : > { %v2328_v13 = vmul.f32 1.442695, %v2325_v12  ;;  %v2721_v12 = vld [vmem:[%s4958_s30 + $0x8] sm:$0xff] }
 0x8c8   : > { %v3581_v14 = vpop.permute.xlu0 %3580  ;;  %2748 = vmatpush.msra.mxu1 %v2721_v12 }
 0x8c9   : > { %3661 = vpow2.f32 %v2328_v13  ;;  %v3582_v15 = vunpack.i.l.bf16 %v3581_v14  ;;  %v3583_v16 = vunpack.i.h.bf16 %v3581_v14  ;;  %v2720_v13 = vld [vmem:[%s4958_s30] sm:$0xff] }
 0x8ca   : > { %2749 = vmatpush.msra.mxu1 %v2720_v13 }
 0x8cb   : > { %2396 = vmatpush.msrb.mxu0 %v3582_v15 }
 0x8cc   : > { %v2471_v17 = vpop.xlane.xlu1 %2470  ;;  %v3576_v26 = vpop.permute.xlu2 %3575 }
 0x8cd   : > { %v2473_v19 = vsub.f32 %v2463_v48, %v2471_v17  ;;  %2397 = vmatpush.msrb.mxu0 %v3583_v16  ;;  %v3577_v29 = vunpack.i.l.bf16 %v3576_v26  ;;  %v3578_v30 = vunpack.i.h.bf16 %v3576_v26 }
 0x8cf   : > { %v3662_v20 = vpop.eup %3661  ;;  %v2476_v21 = vmul.f32 1.442695, %v2473_v19 }
 0x8d0   : > { %v2333_v22 = vsel %vm1901_vm3, %v3662_v20, 0.0 }
 0x8d1   : > { %3663 = vpow2.f32 %v2476_v21  ;;  %2334 = vadd.xlane.f32.xlu0 %v2333_v22 }
 0x8d2   : > { %3585 = vrot.lane.b32.xlu2 %v3574_v57, %s4032_s2 }
 0x8d7   : > { %v3664_v23 = vpop.eup %3663 }
 0x8d8   : > { %v2481_v24 = vsel %vm1901_vm3, %v3664_v23, 0.0 }
 0x8d9   : > { %2482 = vadd.xlane.f32.xlu1 %v2481_v24 }
 0x8e4   : > { %v3571_v25 = vpop.permute.xlu1 %3570 }
 0x8e5   : > { %v3572_v27 = vunpack.i.l.bf16 %v3571_v25  ;;  %3590 = vrot.lane.b32.xlu0 %v3579_v54, %s4030_s8  ;;  %v3573_v28 = vunpack.i.h.bf16 %v3571_v25 }
 0x8e7   : > { %2365 = vmatpush.msra.mxu3 %v3572_v27 }
 0x8e9   : > { %2366 = vmatpush.msra.mxu3 %v3573_v28 }
 0x8eb   : > { %2511 = vmatpush.msrb.mxu3 %v3577_v29 }
 0x8ed   : > { %2512 = vmatpush.msrb.mxu3 %v3578_v30  ;;  %3595 = vrot.lane.b32.xlu0 %v3579_v54, %s4032_s2 }
 0x905   : > { %v2615_v31 = vpop.xlane.xlu2 %2614 }
 0x906   : > { %v2617_v32 = vsub.f32 %v2607_v58, %v2615_v31 }
 0x908   : > { %v2620_v33 = vmul.f32 1.442695, %v2617_v32 }
 0x90a   : > { %3665 = vpow2.f32 %v2620_v33 }
 0x910   : > { %v3666_v35 = vpop.eup %3665 }
 0x911   : > { %v2625_v36 = vsel %vm1901_vm3, %v3666_v35, 0.0 }
 0x912   : > { %2626 = vadd.xlane.f32.xlu2 %v2625_v36 }
 0x925   : > { %v2332_v37 = vpop.xlane.xlu0 %2331 }
 0x926   : > { %3667 = vrcp.f32 %v2332_v37 }
 0x92c   : > { %v3668_v38 = vpop.eup %3667 }
 0x92d   : > { %v2338_v39 = vmul.f32 %v3668_v38, %v3656_v1  ;;  %v2480_v40 = vpop.xlane.xlu2 %2479 }
 0x92e   : > { %3669 = vrcp.f32 %v2480_v40 }
 0x92f   : > { %3413 = vmatmul.msk.f32.vlgmr.msra.gmra.mxu3 %vm1901_vm3, %v2338_v39 }
 0x934   : > { %v3670_v41 = vpop.eup %3669 }
 0x935   : > { %v2486_v43 = vmul.f32 %v3670_v41, %v3658_v4  ;;  %v3586_v44 = vpop.permute.xlu2 %3585  ;;  %v2624_v45 = vpop.xlane.xlu0 %2623 }
 0x936   : > { %v3587_v10 = vunpack.i.l.bf16 %v3586_v44  ;;  %3671 = vrcp.f32 %v2624_v45  ;;  %v3588_v47 = vunpack.i.h.bf16 %v3586_v44  ;;  %v2812_v44 = vld [vmem:[%s4960_s19 + $0x18] sm:$0xff]  ;;  %v2811_v45 = vld [vmem:[%s4960_s19 + $0x10] sm:$0xff] }
 0x937   : > { %3421 = vmatmul.msk.f32.vlgmr.msrb.gmra.mxu3 %vm1901_vm3, %v2486_v43  ;;  %2835 = vmatpush.msra.mxu2 %v2812_v44 }
 0x938   : > { %2655 = vmatpush.msra.mxu3 %v3587_v10  ;;  %v2810_v10 = vld [vmem:[%s4960_s19 + $0x8] sm:$0xff] }
 0x939   : > { %2836 = vmatpush.msra.mxu2 %v2811_v45 }
 0x93a   : > { %2656 = vmatpush.msra.mxu3 %v3588_v47  ;;  %v2809_v47 = vld [vmem:[%s4960_s19] sm:$0xff] }
 0x93b   : > { %2837 = vmatpush.msra.mxu2 %v2810_v10 }
 0x93c   : > { %v3672_v50 = vpop.eup %3671 }
 0x93d   : > { %v2630_v11 = vmul.f32 %v3672_v50, %v3660_v7  ;;  %2838 = vmatpush.msra.mxu2 %v2809_v47 }
 0x93f   : > { %3429 = vmatmul.msk.f32.vlgmr.msra.gmra.mxu3 %vm1901_vm3, %v2630_v11 }
 0x944   : > { %v2335_v53 = vpop.xlane.xlu0 %2334 }
 0x945   : > { %3673 = vrcp.f32 %v2335_v53 }
 0x94b   : > { %v3674_v54 = vpop.eup %3673 }
 0x94c   : > { %v2339_v48 = vmul.f32 %v3674_v54, %v3662_v20  ;;  %v2483_v55 = vpop.xlane.xlu1 %2482 }
 0x94d   : > { %3675 = vrcp.f32 %v2483_v55 }
 0x94e   : > { %3414 = vmatmul.msk.f32.vlgmr.msrb.gmra.mxu0 %vm1901_vm3, %v2339_v48 }
 0x953   : > { %v3676_v58 = vpop.eup %3675 }
 0x954   : > { %v2487_v61 = vmul.f32 %v3676_v58, %v3664_v23 }
 0x957   : > { %v3591_v57 = vpop.permute.xlu0 %3590 }
 0x958   : > { %v3592_v59 = vunpack.i.l.bf16 %v3591_v57  ;;  %v3593_v60 = vunpack.i.h.bf16 %v3591_v57 }
 0x95a   : > { %2540 = vmatpush.msra.mxu0 %v3592_v59 }
 0x95c   : > { %2541 = vmatpush.msra.mxu0 %v3593_v60  ;;  %v2803_v60 = vperm.slane %v4630_v18, 2 }
 0x95d   : > { %3422 = vmatmul.msk.f32.vlgmr.msra.gmra.mxu0 %vm1901_vm3, %v2487_v61 }
 0x95f   : > { %v3596_v62 = vpop.permute.xlu0 %3595 }
 0x960   : > { %v3597_v63 = vunpack.i.l.bf16 %v3596_v62  ;;  %v3598_v0 = vunpack.i.h.bf16 %v3596_v62 }
 0x962   : > { %2684 = vmatpush.msrb.mxu0 %v3597_v63  ;;  %v2806_v63 = vperm.slane %v4630_v18, 3 }
 0x964   : > { %2685 = vmatpush.msrb.mxu0 %v3598_v0 }
 0x985   : > { %v2627_v1 = vpop.xlane.xlu2 %2626 }
 0x986   : > { %3677 = vrcp.f32 %v2627_v1 }
 0x98c   : > { %v3678_v2 = vpop.eup %3677 }
 0x98d   : > { %v2631_v3 = vmul.f32 %v3678_v2, %v3666_v35  ;;  %v2855_v2 = vld [vmem:[%s4438_s26 + $0x38] sm:$0xff] }
 0x98e   : > { %2875 = vmatpush.msrb.mxu3 %v2855_v2 }
 0x98f   : > { %3430 = vmatmul.msk.f32.vlgmr.msrb.gmra.mxu0 %vm1901_vm3, %v2631_v3  ;;  %v2854_v3 = vld [vmem:[%s4438_s26 + $0x30] sm:$0xff] }
 0x990   : > { %2876 = vmatpush.msrb.mxu3 %v2854_v3 }
 0x9b2   : > { %v2368_v46 = vpop.f32.mrf.mxu3 }
 0x9b3   : > { %2692 = vrot.lane.b32.xlu0 %v2368_v46, %s4033_s15  ;;  %v2853_v46 = vld [vmem:[%s4438_s26 + $0x28] sm:$0xff] }
 0x9b4   : > { %2877 = vmatpush.msrb.mxu3 %v2853_v46 }
 0x9ba   : > { %v2514_v56 = vpop.f32.mrf.mxu3 }
 0x9bb   : > { %2700 = vrot.lane.b32.xlu0 %v2514_v56, %s4034_s16 }
 0x9c2   : > { %v2658_v4 = vpop.f32.mrf.mxu3 }
 0x9c3   : > { %2708 = vrot.lane.b32.xlu1 %v2658_v4, %s4035_s29 }
 0x9cb   : > { %v2399_v5 = vpop.f32.mrf.mxu0 }
 0x9cc   : > { %2694 = vrot.lane.b32.xlu0 %v2399_v5, %s4033_s15  ;;  %v2852_v5 = vld [vmem:[%s4438_s26 + $0x20] sm:$0xff] }
 0x9cd   : > { %2878 = vmatpush.msrb.mxu3 %v2852_v5 }
 0x9da   : > { %v2543_v6 = vpop.f32.mrf.mxu0 }
 0x9db   : > { %2702 = vrot.lane.b32.xlu0 %v2543_v6, %s4034_s16 }
 0xa0c   : > { %v2687_v7 = vpop.f32.mrf.mxu0 }
 0xa0d   : > { %2710 = vrot.lane.b32.xlu2 %v2687_v7, %s4035_s29  ;;  %v2851_v7 = vld [vmem:[%s4438_s26 + $0x18] sm:$0xff] }
 0xa0e   : > { %2879 = vmatpush.msrb.mxu3 %v2851_v7 }
 0xa25   : > { %v2693_v14 = vpop.permute.xlu0 %2692 }
 0xa26   : > { %v2714_v16 = vsel %vm1362_vm2, %v4723_v42, %v2693_v14  ;;  %v3606_v42 = vld [vmem:[%s1230_s12] ss:$0 sm:$0xff]  ;;  %s4961_s12 = sld [smem:[#allocation31_spill]] }
 0xa2c   : > { %s4962_s24 = scalar_lea.vmem [#allocation15], %s4961_s12 }
 0xa2d   : > { %v2701_v15 = vpop.permute.xlu0 %2700 }
 0xa2e   : > { %v2716_v17 = vsel %vm1901_vm3, %v2714_v16, %v2701_v15 }
 0xa35   : > { %v2709_v19 = vpop.permute.xlu1 %2708 }
 0xa36   : > { %v2718_v20 = vsel %vm1904_vm4, %v2716_v17, %v2709_v19 }
 0xa37   : > { %3431 = vmatmul.msk.f32.vlgmr.msra.gmra.mxu1 %vm1268_vm1, %v2718_v20 }
 0xa3e   : > { %v2695_v21 = vpop.permute.xlu0 %2694 }
 0xa3f   : > { %v2715_v23 = vsel %vm1362_vm2, %v4728_v51, %v2695_v21  ;;  %v2850_v21 = vld [vmem:[%s4438_s26 + $0x10] sm:$0xff] }
 0xa40   : > { %2880 = vmatpush.msrb.mxu3 %v2850_v21 }
 0xa4d   : > { %v2703_v22 = vpop.permute.xlu0 %2702 }
 0xa4e   : > { %v2717_v24 = vsel %vm1901_vm3, %v2715_v23, %v2703_v22  ;;  %v2849_v22 = vld [vmem:[%s4438_s26 + $0x8] sm:$0xff]  ;;  %v2848_v23 = vld [vmem:[%s4438_s26] sm:$0xff]  ;;  %vm2860_vm3 = vcmask 523264   ;;  %s4037_s26 = smov [#allocation17]  }
 0xa4f   : > { %2881 = vmatpush.msrb.mxu3 %v2849_v22 }
 0xa51   : > { %2882 = vmatpush.msrb.mxu3 %v2848_v23 }
 0xa67   : > { %v2711_v25 = vpop.permute.xlu2 %2710 }
 0xa68   : > { %v2719_v26 = vsel %vm1904_vm4, %v2717_v24, %v2711_v25  ;;  %v3607_v24 = vld [vmem:[%s4962_s24] ss:$0 sm:$0xff] }
 0xa69   : > { %3432 = vmatmul.msk.f32.gmra.mxu1 %vm1268_vm1, %v2719_v26 }
 0xab4   : > { %v2751_v27 = vpop.f32.mrf.mxu1 }
 0xab5   : > { %v2752_v28 = vadd.f32 %v3606_v42, %v2751_v27 }
 0xab7   : > { %v2757_v29 = vadd.f32 %v2752_v28, %v4639_v34 }
 0xab9   : > { %v2759_v30 = vsel %vm1268_vm1, %v2757_v29, 0.0 }
 0xaba   : > { %2760 = vadd.xlane.f32.xlu0 %v2759_v30  ;;  %v3608_v30 = vld [vmem:[%s1242_s27] ss:$0 sm:$0xff]  ;;  %s2954_s27 = sshll.u32 %s4037_s26, 4  ;;  %s2955_s27 = int_to_ptr.vmem [resolvable:$true] %s2954_s27 }
 0xae6   : > { %v2754_v51 = vpop.f32.mrf.mxu1 }
 0xae7   : > { %v2755_v31 = vadd.f32 %v3606_v42, %v2754_v51 }
 0xae9   : > { %v2758_v32 = vadd.f32 %v2755_v31, %v4657_v49 }
 0xaeb   : > { %v2762_v33 = vsel %vm1268_vm1, %v2758_v32, 0.0 }
 0xaec   : > { %2763 = vadd.xlane.f32.xlu1 %v2762_v33 }
 0xb2d   : > { %v2761_v35 = vpop.xlane.xlu0 %2760 }
 0xb2e   : > { %v2765_v36 = vmul.f32 %v2761_v35, %v4593_v52 }
 0xb30   : > { %v2767_v37 = vsub.f32 %v2757_v29, %v2765_v36 }
 0xb32   : > { %v2769_v38 = vmul.f32 %v2767_v37, %v2767_v37 }
 0xb34   : > { %v2771_v34 = vsel %vm1268_vm1, %v2769_v38, 0.0 }
 0xb35   : > { %2772 = vadd.xlane.f32.xlu2 %v2771_v34 }
 0xb5f   : > { %v2764_v39 = vpop.xlane.xlu1 %2763 }
 0xb60   : > { %v2766_v40 = vmul.f32 %v2764_v39, %v4593_v52 }
 0xb62   : > { %v2768_v41 = vsub.f32 %v2758_v32, %v2766_v40 }
 0xb64   : > { %v2770_v43 = vmul.f32 %v2768_v41, %v2768_v41 }
 0xb66   : > { %v2774_v49 = vsel %vm1268_vm1, %v2770_v43, 0.0 }
 0xb67   : > { %2775 = vadd.xlane.f32.xlu0 %v2774_v49 }
 0xba8   : > { %v2773_v50 = vpop.xlane.xlu2 %2772 }
 0xba9   : > { %v2777_v11 = vmul.f32 %v2773_v50, %v4593_v52 }
 0xbab   : > { %v2779_v53 = vadd.f32 1e-05, %v2777_v11 }
 0xbad   : > { %3679 = vrsqrt.f32 %v2779_v53  ;;  %vm2787_vm13 = vweird.f32 %v2779_v53 }
 0xbb3   : > { %v3680_v54 = vpop.eup %3679 }
 0xbb4   : > { %v2782_v48 = vmul.f32 %v3680_v54, %v2779_v53  ;;  %vm2788_vm12 = vweird.f32 %v3680_v54 }
 0xbb5   : > { %vm2789_vm14 = vmor %vm2787_vm13, %vm2788_vm12 }
 0xbb6   : > { %v2783_v55 = vmul.f32 %v3680_v54, %v2782_v48 }
 0xbb8   : > { %v2784_v57 = vmul.f32 0.5, %v2783_v55 }
 0xbba   : > { %v2785_v58 = vsub.f32 1.5, %v2784_v57 }
 0xbbc   : > { %v2786_v59 = vmul.f32 %v3680_v54, %v2785_v58 }
 0xbbe   : > { %v2790_v61 = vsel %vm2789_vm14, %v3680_v54, %v2786_v59 }
 0xbbf   : > { %v2801_v62 = vmul.f32 %v2790_v61, %v2767_v37 }
 0xbc1   : > { %v2804_v0 = vmul.f32 %v2803_v60, %v2801_v62 }
 0xbc3   : > { %v2807_v1 = vadd.f32 %v2806_v63, %v2804_v0 }
 0xbc5   : > { %3433 = vmatmul.msk.f32.vlgmr.msra.gmra.mxu2 %vm1268_vm1, %v2807_v1 }
 0xbda   : > { %v2776_v56 = vpop.xlane.xlu0 %2775 }
 0xbdb   : > { %v2778_v4 = vmul.f32 %v2776_v56, %v4593_v52 }
 0xbdd   : > { %v2780_v6 = vadd.f32 1e-05, %v2778_v4 }
 0xbdf   : > { %3681 = vrsqrt.f32 %v2780_v6  ;;  %vm2797_vm0 = vweird.f32 %v2780_v6 }
 0xbe5   : > { %v3682_v8 = vpop.eup %3681 }
 0xbe6   : > { %v2792_v9 = vmul.f32 %v3682_v8, %v2780_v6  ;;  %vm2798_vm15 = vweird.f32 %v3682_v8 }
 0xbe7   : > { %vm2799_vm2 = vmor %vm2797_vm0, %vm2798_vm15 }
 0xbe8   : > { %v2793_v12 = vmul.f32 %v3682_v8, %v2792_v9 }
 0xbea   : > { %v2794_v13 = vmul.f32 0.5, %v2793_v12 }
 0xbec   : > { %v2795_v14 = vsub.f32 1.5, %v2794_v13 }
 0xbee   : > { %v2796_v15 = vmul.f32 %v3682_v8, %v2795_v14 }
 0xbf0   : > { %v2800_v16 = vsel %vm2799_vm2, %v3682_v8, %v2796_v15 }
 0xbf1   : > { %v2802_v17 = vmul.f32 %v2800_v16, %v2768_v41 }
 0xbf3   : > { %v2805_v19 = vmul.f32 %v2803_v60, %v2802_v17  ;;  %v2936_v60 = vperm.slane %v4630_v18, 4 }
 0xbf5   : > { %v2808_v20 = vadd.f32 %v2806_v63, %v2805_v19  ;;  %v2939_v63 = vperm.slane %v4630_v18, 5 }
 0xbf7   : > { %3434 = vmatmul.msk.f32.gmra.mxu2 %vm1268_vm1, %v2808_v20 }
 0xc48   : > { %v2840_v25 = vpop.f32.mrf.mxu2 }
 0xc49   : > { %v2841_v26 = vadd.f32 %v3607_v24, %v2840_v25 }
 0xc4b   : > { %v2846_v42 = vmax.f32 %v2841_v26, 0.0 }
 0xc4d   : > { %3435 = vmatmul.msk.f32.vlgmr.msrb.gmra.mxu3 %vm2860_vm3, %v2846_v42 }
 0xc7a   : > { %v2843_v27 = vpop.f32.mrf.mxu2 }
 0xc7b   : > { %v2844_v28 = vadd.f32 %v3607_v24, %v2843_v27 }
 0xc7d   : > { %v2847_v29 = vmax.f32 %v2844_v28, 0.0 }
 0xc7f   : > { %3436 = vmatmul.msk.f32.gmra.mxu3 %vm2860_vm3, %v2847_v29 }
 0xcd0   : > { %v2884_v51 = vpop.f32.mrf.mxu3 }
 0xcd1   : > { %v2885_v31 = vadd.f32 %v3608_v30, %v2884_v51 }
 0xcd3   : > { %v2890_v32 = vadd.f32 %v2885_v31, %v2807_v1 }
 0xcd5   : > { %v2892_v33 = vsel %vm1268_vm1, %v2890_v32, 0.0 }
 0xcd6   : > { %2893 = vadd.xlane.f32.xlu1 %v2892_v33 }
 0xd02   : > { %v2887_v35 = vpop.f32.mrf.mxu3 }
 0xd03   : > { %v2888_v36 = vadd.f32 %v3608_v30, %v2887_v35 }
 0xd05   : > { %v2891_v37 = vadd.f32 %v2888_v36, %v2808_v20 }
 0xd07   : > { %v2895_v38 = vsel %vm1268_vm1, %v2891_v37, 0.0 }
 0xd08   : > { %2896 = vadd.xlane.f32.xlu0 %v2895_v38 }
 0xd49   : > { %v2894_v34 = vpop.xlane.xlu1 %2893 }
 0xd4a   : > { %v2898_v39 = vmul.f32 %v2894_v34, %v4593_v52 }
 0xd4c   : > { %v2900_v40 = vsub.f32 %v2890_v32, %v2898_v39 }
 0xd4e   : > { %v2902_v41 = vmul.f32 %v2900_v40, %v2900_v40 }
 0xd50   : > { %v2904_v43 = vsel %vm1268_vm1, %v2902_v41, 0.0 }
 0xd51   : > { %2905 = vadd.xlane.f32.xlu1 %v2904_v43 }
 0xd7b   : > { %v2897_v49 = vpop.xlane.xlu0 %2896 }
 0xd7c   : > { %v2899_v44 = vmul.f32 %v2897_v49, %v4593_v52 }
 0xd7e   : > { %v2901_v45 = vsub.f32 %v2891_v37, %v2899_v44 }
 0xd80   : > { %v2903_v10 = vmul.f32 %v2901_v45, %v2901_v45 }
 0xd82   : > { %v2907_v47 = vsel %vm1268_vm1, %v2903_v10, 0.0 }
 0xd83   : > { %2908 = vadd.xlane.f32.xlu0 %v2907_v47 }
 0xdc4   : > { %v2906_v50 = vpop.xlane.xlu1 %2905 }
 0xdc5   : > { %v2910_v11 = vmul.f32 %v2906_v50, %v4593_v52 }
 0xdc7   : > { %v2912_v53 = vadd.f32 1e-05, %v2910_v11 }
 0xdc9   : > { %3683 = vrsqrt.f32 %v2912_v53  ;;  %vm2920_vm5 = vweird.f32 %v2912_v53 }
 0xdcf   : > { %v3684_v54 = vpop.eup %3683 }
 0xdd0   : > { %v2915_v48 = vmul.f32 %v3684_v54, %v2912_v53  ;;  %vm2921_vm4 = vweird.f32 %v3684_v54 }
 0xdd1   : > { %vm2922_vm6 = vmor %vm2920_vm5, %vm2921_vm4 }
 0xdd2   : > { %v2916_v55 = vmul.f32 %v3684_v54, %v2915_v48 }
 0xdd4   : > { %v2917_v57 = vmul.f32 0.5, %v2916_v55 }
 0xdd6   : > { %v2918_v58 = vsub.f32 1.5, %v2917_v57 }
 0xdd8   : > { %v2919_v59 = vmul.f32 %v3684_v54, %v2918_v58 }
 0xdda   : > { %v2923_v61 = vsel %vm2922_vm6, %v3684_v54, %v2919_v59 }
 0xddb   : > { %v2934_v62 = vmul.f32 %v2923_v61, %v2900_v40 }
 0xddd   : > { %v2937_v0 = vmul.f32 %v2936_v60, %v2934_v62 }
 0xddf   : > { %v2940_v1 = vadd.f32 %v2939_v63, %v2937_v0 }
 0xde1   : > { %2942 = vst.msk [vmem:[#allocation2] sm:$0xff] %vm1268_vm1, %v2940_v1 }
 0xde2   : > { %2944 = vst.msk [vmem:[#allocation17] sm:$0xff] %vm1268_vm1, %v2940_v1 }
 0xdf6   : > { %v2909_v2 = vpop.xlane.xlu0 %2908 }
 0xdf7   : > { %v2911_v3 = vmul.f32 %v2909_v2, %v4593_v52 }
 0xdf9   : > { %v2913_v46 = vadd.f32 1e-05, %v2911_v3 }
 0xdfb   : > { %3685 = vrsqrt.f32 %v2913_v46  ;;  %vm2930_vm8 = vweird.f32 %v2913_v46 }
 0xe01   : > { %v3686_v56 = vpop.eup %3685 }
 0xe02   : > { %v2925_v4 = vmul.f32 %v3686_v56, %v2913_v46  ;;  %vm2931_vm7 = vweird.f32 %v3686_v56 }
 0xe03   : > { %vm2932_vm9 = vmor %vm2930_vm8, %vm2931_vm7 }
 0xe04   : > { %v2926_v5 = vmul.f32 %v3686_v56, %v2925_v4 }
 0xe06   : > { %v2927_v6 = vmul.f32 0.5, %v2926_v5 }
 0xe08   : > { %v2928_v7 = vsub.f32 1.5, %v2927_v6 }
 0xe0a   : > { %v2929_v8 = vmul.f32 %v3686_v56, %v2928_v7 }
 0xe0c   : > { %v2933_v18 = vsel %vm2932_vm9, %v3686_v56, %v2929_v8 }
 0xe0d   : > { %v2935_v9 = vmul.f32 %v2933_v18, %v2901_v45 }
 0xe0f   : > { %v2938_v12 = vmul.f32 %v2936_v60, %v2935_v9 }
 0xe11   : > { %v2941_v52 = vadd.f32 %v2939_v63, %v2938_v12 }
 0xe13   : > { %2943 = vst.msk [vmem:[#allocation2 + $0x8] sm:$0xff] %vm1268_vm1, %v2941_v52 }
 0xe14   : > { %2945 = vst.msk [vmem:[#allocation17 + $0x8] sm:$0xff] %vm1268_vm1, %v2941_v52 }
 0xe15   : > { %3470 = dma.vmem_to_hbm [thread:$0]  (%p3502_p3), %s2955_s27, 256, %s2957_s22, [#allocation5], %s4038_s18, %s4038_s18, %s4033_s15  }
 0xe16   : > { %4000 = dma.done.wait (%p3502_p3), [#allocation5], 256  }
 0xe17   : > { %4002 = vsyncadd (%p3502_p3), [#allocation5], 4294967040 }
 0xe18 PF: > { %s4966_s4 = sld [smem:[#allocation27_spill]] }
 0xe19   : > { %s4968_s30 = sld [smem:[#allocation25_spill]] }
 0xe1a   : > { %s4969_s24 = sld [smem:[#allocation29_spill]] }
 0xe1b   : > { %s4970_s25 = sld [smem:[#allocation26_spill]] }
 0xe1c   : > { %s4971_s5 = sld [smem:[#allocation28_spill]] }
 0xe1e   : > { %s47_s1 = sadd.s32 1, %s4966_s4   ;;  %s4967_s4 = sld [smem:[#allocation24_spill]] }
 0xe1f   : > { %p44_p4 = scmp.ge.s32.totalorder %s47_s1, 4  }
 0xe21   :  { %46 = sbr.rel (!%p44_p4) target bundleno = 34 (0x22), region = 277 }
 0xe26   :  { %2973 = vsyncpa [#allocation4], 1 }
 0xe27   :  { %2975 = vsyncpa [#allocation4 + $0x1], 1 }
 0xe28   :  { %2976 = vsyncpa [#allocation7], 1 }
 0xe29   :  { %2978 = vsyncpa [#allocation7 + $0x1], 1 }
 0xe2a   :  { %2979 = vsyncpa [#allocation10], 1 }
 0xe2b   :  { %2981 = vsyncpa [#allocation10 + $0x1], 1 }
 0xe2c   :  { %2982 = vsyncpa [#allocation13], 1 }
 0xe2d   :  { %2984 = vsyncpa [#allocation13 + $0x1], 1 }
 0xe2e   :  { %2985 = vsyncpa [#allocation16], 1 }
 0xe2f   :  { %2987 = vsyncpa [#allocation16 + $0x1], 1 }
 0xe30   :  { %2988 = vsyncpa [#allocation5], 1 }
 0xe31   :  { %2990 = vsyncpa [#allocation5 + $0x1], 1 }

</bundles_post_ra>
